<compile_context>
chip_gen: v5e
topology: v5e:2x2
jax: 0.10.0
libtpu: 0.0.40
codegen_flags: <defaults>
</compile_context>

<pallas_src>
import jax
import jax.numpy as jnp
from jax import lax
from jax.experimental import pallas as pl
from jax.experimental.pallas import tpu as pltpu


_PAD = 16  # leading zero rows per image slot in the strip (== inter-image gap)


def _basic_block_kernel(x_ref, s1_ref, b1_ref, w1_ref, s2_ref, b2_ref, w2_ref,
                        o_ref, pad_ref, y_ref):
    nb, h, wc = x_ref.shape
    rs = h + _PAD                      # per-image row stride in the padded strip
    m = nb * rs                        # conv-output rows (incl. dead gap rows)
    mc = m if m <= 128 else 128        # M-chunk per matmul (bounds vreg pressure)
    assert m % mc == 0

    s1 = s1_ref[0]
    b1 = b1_ref[0]
    s2 = s2_ref[0]
    b2 = b2_ref[0]

    # ---- zero only the border rows of the bf16 strip.  Image rows are fully
    #      overwritten below.  Done every grid step (NOT gated on program_id)
    #      so it stays correct under "parallel" megacore sharding. ----
    zeros_gap = jnp.zeros((_PAD, wc), pad_ref.dtype)
    pad_ref[pl.ds(0, _PAD), :] = zeros_gap              # head
    pad_ref[pl.ds(m + _PAD, _PAD), :] = zeros_gap       # tail rows read by dead j's

    def conv_into_y(w_ref):
        # y[j] = sum_k pad[j + _PAD - 1 + k] @ Wb[k]   (kh taps = row shifts of
        # the strip; kw taps + column zero-padding are folded into the banded
        # (wc, wc) weights).  Chunked over M so the f32 result goes straight to
        # the y_ref VMEM scratch instead of living in vregs.
        for c0 in range(m // mc):
            base = c0 * mc
            acc = jnp.dot(pad_ref[pl.ds(base + _PAD - 1, mc), :], w_ref[0],
                          preferred_element_type=jnp.float32)
            acc = acc + jnp.dot(pad_ref[pl.ds(base + _PAD, mc), :], w_ref[1],
                                preferred_element_type=jnp.float32)
            acc = acc + jnp.dot(pad_ref[pl.ds(base + _PAD + 1, mc), :], w_ref[2],
                                preferred_element_type=jnp.float32)
            y_ref[pl.ds(base, mc), :] = acc

    # ---- phase A: strip <- relu(bn1(x)) as bf16, plus per-image gap zeros ----
    # (static offsets; at block_n=4 static unrolling keeps vreg pressure low —
    #  switch to lax.fori_loop if block_n is raised much further)
    for n in range(nb):
        act = jnp.maximum(x_ref[n] * s1 + b1, 0.0)             # (h, wc) f32 VPU
        pad_ref[pl.ds(n * rs + _PAD, h), :] = act.astype(pad_ref.dtype)
        pad_ref[pl.ds(n * rs + _PAD + h, _PAD), :] = zeros_gap  # gap after image n

    conv_into_y(w1_ref)                # y_ref <- conv1(relu(bn1(x)))

    # ---- phase B: strip <- relu(bn2(y1)) as bf16 (gap rows stay zero) ----
    for n in range(nb):
        r = y_ref[pl.ds(n * rs, h), :]                         # 8/32-aligned slice
        pad_ref[pl.ds(n * rs + _PAD, h), :] = (
            jnp.maximum(r * s2 + b2, 0.0).astype(pad_ref.dtype))

    conv_into_y(w2_ref)                # y_ref <- conv2(relu(bn2(y1)))

    # ---- phase C: residual add + lane-dense (full 128-lane) store ----
    for n in range(nb):
        o_ref[n] = (y_ref[pl.ds(n * rs, h), :] + x_ref[n]).astype(o_ref.dtype)


def _fold_bn(gamma, beta, mean, var, eps=1e-5):
    scale = gamma / jnp.sqrt(var + eps)
    return scale, beta - mean * scale


def _band_conv_weight(w_oihw, width, dtype=jnp.bfloat16):
    """Fold the kw taps of a 3x3 conv into three block-banded (W*Cin, W*Cout)
    matrices (one per kh tap) so the W axis rides the 128-lane axis of the MXU.
    The band structure also implements the zero padding along W."""
    cout, cin, kh, kw = w_oihw.shape
    assert kh == 3 and kw == 3, "only 3x3 kernels supported"
    w = jnp.transpose(w_oihw, (2, 3, 1, 0))                 # OIHW -> HWIO (3,3,Cin,Cout)
    wi = jnp.arange(width)[:, None, None]                   # input column  w_in
    k = jnp.arange(3)[None, :, None]                        # kw tap
    wo = jnp.arange(width)[None, None, :]                   # output column w_out
    band = (wo == wi - k + 1).astype(w.dtype)               # (W, 3, W)
    wb = jnp.einsum("xky,hkio->hxiyo", band, w)             # (3, W, Cin, W, Cout)
    return wb.reshape(3, width * cin, width * cout).astype(dtype)


def prepare_basic_block_params(params, width, compute_dtype=jnp.bfloat16):
    """One-time parameter prep (layout plumbing hoisted out of the hot path)."""
    s1, b1 = _fold_bn(*params["bn1"])
    s2, b2 = _fold_bn(*params["bn2"])

    def lane(v):  # per-channel vector -> per-(w*C + c) lane vector
        return jnp.tile(v, width).reshape(1, -1).astype(jnp.float32)

    return {
        "s1": lane(s1), "b1": lane(b1), "s2": lane(s2), "b2": lane(b2),
        "w1": _band_conv_weight(params["conv1_w"], width, compute_dtype),
        "w2": _band_conv_weight(params["conv2_w"], width, compute_dtype),
    }


def basic_block_nhwc(x_nhwc, prep, *, block_n=4):
    """Fused BasicBlock forward on NHWC activations (stride=1, equalInOut)."""
    n, h, w, c = x_nhwc.shape
    wc = w * c
    assert wc % 128 == 0, "W*C must be a multiple of 128 (lane-dense layout)"
    assert h % 8 == 0, "H must be a multiple of 8"
    assert n % block_n == 0, "batch must be divisible by block_n"
    rs = h + _PAD
    m = block_n * rs
    assert m <= 128 or m % 128 == 0, "block_n*(H+16) must be <=128 or a multiple of 128"
    mtot = m + 2 * _PAD

    x2 = x_nhwc.reshape(n, h, wc)                 # lane-dense presentation
    blk = lambda i: (i, 0, 0)
    vec = lambda i: (0, 0)
    wmap = lambda i: (0, 0, 0)

    out = pl.pallas_call(
        _basic_block_kernel,
        out_shape=jax.ShapeDtypeStruct((n, h, wc), x_nhwc.dtype),
        grid_spec=pltpu.PrefetchScalarGridSpec(
            num_scalar_prefetch=0,
            grid=(n // block_n,),
            in_specs=[
                pl.BlockSpec((block_n, h, wc), blk),        # x (also the residual)
                pl.BlockSpec((1, wc), vec),                 # bn1 scale (lane-tiled)
                pl.BlockSpec((1, wc), vec),                 # bn1 bias
                pl.BlockSpec((3, wc, wc), wmap),            # conv1 banded weights (per kh)
                pl.BlockSpec((1, wc), vec),                 # bn2 scale
                pl.BlockSpec((1, wc), vec),                 # bn2 bias
                pl.BlockSpec((3, wc, wc), wmap),            # conv2 banded weights
            ],
            out_specs=pl.BlockSpec((block_n, h, wc), blk),
            scratch_shapes=[
                pltpu.VMEM((mtot, wc), jnp.bfloat16),       # padded activation strip
                pltpu.VMEM((m, wc), jnp.float32),           # conv output / f32 accum
            ],
        ),
        compiler_params=pltpu.CompilerParams(
            dimension_semantics=("parallel",),
        ),
    )(x2, prep["s1"], prep["b1"], prep["w1"], prep["s2"], prep["b2"], prep["w2"])
    return out.reshape(n, h, w, c)


def basic_block_forward(x_nchw, prep, *, block_n=4):
    """NCHW interface matching the PyTorch module.  In a full network, keep
    activations NHWC across blocks instead of transposing per block."""
    x = jnp.transpose(x_nchw, (0, 2, 3, 1))
    y = basic_block_nhwc(x, prep, block_n=block_n)
    return jnp.transpose(y, (0, 3, 1, 2))


def basic_block_reference(x, params, matmul_dtype=jnp.float32):
    """Pure-JAX reference (NCHW / OIHW).  matmul_dtype=bfloat16 emulates the
    kernel's MXU operand precision (f32 accumulation in both cases)."""
    def bn(v, p):
        g, b, m, var = p
        inv = g / jnp.sqrt(var + 1e-5)
        return v * inv[None, :, None, None] + (b - m * inv)[None, :, None, None]

    def conv3x3(v, w):
        return lax.conv_general_dilated(
            v.astype(matmul_dtype), w.astype(matmul_dtype),
            window_strides=(1, 1), padding=((1, 1), (1, 1)),
            dimension_numbers=("NCHW", "OIHW", "NCHW"),
            preferred_element_type=jnp.float32)

    a1 = jax.nn.relu(bn(x, params["bn1"]))
    c1 = conv3x3(a1, params["conv1_w"])
    a2 = jax.nn.relu(bn(c1, params["bn2"]))
    c2 = conv3x3(a2, params["conv2_w"])
    return x + c2


if __name__ == "__main__":
    key = jax.random.PRNGKey(0)
    ks = jax.random.split(key, 5)

    # BasicBlock(in_planes=8, out_planes=8, stride=1, dropRate=0.0)
    # W * C = 16 * 8 = 128 -> the lane axis is exactly full.
    # N=8 with block_n=4: M=128 per grid step, grid=2 (both v7x cores busy).
    N, C, H, W = 8, 8, 16, 16
    x = jax.random.normal(ks[0], (N, C, H, W), jnp.float32)

    def bn_params(k):
        k1, k2, k3, k4 = jax.random.split(k, 4)
        gamma = 1.0 + 0.1 * jax.random.normal(k1, (C,), jnp.float32)
        beta = 0.1 * jax.random.normal(k2, (C,), jnp.float32)
        mean = 0.1 * jax.random.normal(k3, (C,), jnp.float32)
        var = jax.random.uniform(k4, (C,), jnp.float32, minval=0.5, maxval=1.5)
        return (gamma, beta, mean, var)

    fan = 3 * 3 * C
    params = {
        "bn1": bn_params(ks[1]),
        "bn2": bn_params(ks[2]),
        "conv1_w": jax.random.normal(ks[3], (C, C, 3, 3), jnp.float32) * fan ** -0.5,
        "conv2_w": jax.random.normal(ks[4], (C, C, 3, 3), jnp.float32) * fan ** -0.5,
    }

    prep = prepare_basic_block_params(params, W)            # one-time prep
    out = jax.block_until_ready(basic_block_forward(x, prep, block_n=4))

    ref_bf16 = basic_block_reference(x, params, jnp.bfloat16)  # kernel precision
    ref_f32 = basic_block_reference(x, params, jnp.float32)    # module precision
    err_b = float(jnp.max(jnp.abs(out - ref_bf16)))
    err_f = float(jnp.max(jnp.abs(out - ref_f32)))

    assert out.shape == (N, C, H, W) and out.dtype == jnp.float32
    assert err_b < 2e-2, f"max abs error vs bf16-matmul reference: {err_b}"
    assert err_f < 0.15, f"max abs error vs f32 reference: {err_f}"
    print("KERNEL_OK")
</pallas_src>

<mosaic_0001>
module attributes {stable_mosaic.version = 11 : i64} {
  func.func @_basic_block_kernel(%arg0: i32, %arg1: memref<4x16x128xf32, #tpu.memory_space<vmem>>, %arg2: memref<1x128xf32, #tpu.memory_space<vmem>>, %arg3: memref<1x128xf32, #tpu.memory_space<vmem>>, %arg4: memref<3x128x128xbf16, #tpu.memory_space<vmem>>, %arg5: memref<1x128xf32, #tpu.memory_space<vmem>>, %arg6: memref<1x128xf32, #tpu.memory_space<vmem>>, %arg7: memref<3x128x128xbf16, #tpu.memory_space<vmem>>, %arg8: memref<4x16x128xf32, #tpu.memory_space<vmem>>, %arg9: memref<160x128xbf16, #tpu.memory_space<vmem>>, %arg10: memref<128x128xf32, #tpu.memory_space<vmem>>) attributes {dimension_semantics = [#tpu.dimension_semantics<parallel>], iteration_bounds = array<i64: 2>, scalar_prefetch = 0 : i64, scratch_operands = 2 : i64, tpu.core_type = #tpu.core_type<tc>, window_params = [{transform_indices = @transform_0, window_bounds = array<i64: 4, 16, 128>}, {pipeline_mode = #tpu.pipeline_mode<synchronous>, transform_indices = @transform_1, window_bounds = array<i64: 1, 128>}, {pipeline_mode = #tpu.pipeline_mode<synchronous>, transform_indices = @transform_2, window_bounds = array<i64: 1, 128>}, {pipeline_mode = #tpu.pipeline_mode<synchronous>, transform_indices = @transform_3, window_bounds = array<i64: 3, 128, 128>}, {pipeline_mode = #tpu.pipeline_mode<synchronous>, transform_indices = @transform_4, window_bounds = array<i64: 1, 128>}, {pipeline_mode = #tpu.pipeline_mode<synchronous>, transform_indices = @transform_5, window_bounds = array<i64: 1, 128>}, {pipeline_mode = #tpu.pipeline_mode<synchronous>, transform_indices = @transform_6, window_bounds = array<i64: 3, 128, 128>}, {transform_indices = @transform_7, window_bounds = array<i64: 4, 16, 128>}]} {
    %c0 = arith.constant 0 : index
    %c0_0 = arith.constant 0 : index
    %0 = vector.load %arg2[%c0, %c0_0] : memref<1x128xf32, #tpu.memory_space<vmem>>, vector<1x128xf32>
    %1 = vector.shape_cast %0 : vector<1x128xf32> to vector<128xf32>
    %c0_1 = arith.constant 0 : index
    %c0_2 = arith.constant 0 : index
    %2 = vector.load %arg3[%c0_1, %c0_2] : memref<1x128xf32, #tpu.memory_space<vmem>>, vector<1x128xf32>
    %3 = vector.shape_cast %2 : vector<1x128xf32> to vector<128xf32>
    %c0_3 = arith.constant 0 : index
    %c0_4 = arith.constant 0 : index
    %4 = vector.load %arg5[%c0_3, %c0_4] : memref<1x128xf32, #tpu.memory_space<vmem>>, vector<1x128xf32>
    %5 = vector.shape_cast %4 : vector<1x128xf32> to vector<128xf32>
    %c0_5 = arith.constant 0 : index
    %c0_6 = arith.constant 0 : index
    %6 = vector.load %arg6[%c0_5, %c0_6] : memref<1x128xf32, #tpu.memory_space<vmem>>, vector<1x128xf32>
    %7 = vector.shape_cast %6 : vector<1x128xf32> to vector<128xf32>
    %cst = arith.constant 0.000000e+00 : bf16
    %8 = vector.broadcast %cst : bf16 to vector<16x128xbf16>
    %c0_7 = arith.constant 0 : index
    %c0_8 = arith.constant 0 : index
    %9 = vector.load %arg9[%c0_7, %c0_8] : memref<160x128xbf16, #tpu.memory_space<vmem>>, vector<16x128xbf16>
    tpu.vector_store %arg9[%c0_7, %c0_8], %8 {strides = array<i32>} : memref<160x128xbf16, #tpu.memory_space<vmem>>, vector<16x128xbf16>,
    %c144 = arith.constant 144 : index
    %c0_9 = arith.constant 0 : index
    %10 = vector.load %arg9[%c144, %c0_9] : memref<160x128xbf16, #tpu.memory_space<vmem>>, vector<16x128xbf16>
    tpu.vector_store %arg9[%c144, %c0_9], %8 {strides = array<i32>} : memref<160x128xbf16, #tpu.memory_space<vmem>>, vector<16x128xbf16>,
    %c0_10 = arith.constant 0 : index
    %c0_11 = arith.constant 0 : index
    %c0_12 = arith.constant 0 : index
    %11 = vector.load %arg1[%c0_10, %c0_11, %c0_12] : memref<4x16x128xf32, #tpu.memory_space<vmem>>, vector<1x16x128xf32>
    %12 = vector.shape_cast %11 : vector<1x16x128xf32> to vector<16x128xf32>
    %13 = vector.shape_cast %1 : vector<128xf32> to vector<1x128xf32>
    %14 = vector.broadcast %13 : vector<1x128xf32> to vector<16x128xf32>
    %15 = arith.mulf %12, %14 : vector<16x128xf32>
    %16 = vector.shape_cast %3 : vector<128xf32> to vector<1x128xf32>
    %17 = vector.broadcast %16 : vector<1x128xf32> to vector<16x128xf32>
    %18 = arith.addf %15, %17 : vector<16x128xf32>
    %cst_13 = arith.constant 0.000000e+00 : f32
    %19 = vector.broadcast %cst_13 : f32 to vector<16x128xf32>
    %20 = arith.maximumf %18, %19 : vector<16x128xf32>
    %21 = arith.truncf %20 : vector<16x128xf32> to vector<16x128xbf16>
    %c16 = arith.constant 16 : index
    %c0_14 = arith.constant 0 : index
    %22 = vector.load %arg9[%c16, %c0_14] : memref<160x128xbf16, #tpu.memory_space<vmem>>, vector<16x128xbf16>
    tpu.vector_store %arg9[%c16, %c0_14], %21 {strides = array<i32>} : memref<160x128xbf16, #tpu.memory_space<vmem>>, vector<16x128xbf16>,
    %c32 = arith.constant 32 : index
    %c0_15 = arith.constant 0 : index
    %23 = vector.load %arg9[%c32, %c0_15] : memref<160x128xbf16, #tpu.memory_space<vmem>>, vector<16x128xbf16>
    tpu.vector_store %arg9[%c32, %c0_15], %8 {strides = array<i32>} : memref<160x128xbf16, #tpu.memory_space<vmem>>, vector<16x128xbf16>,
    %c1 = arith.constant 1 : index
    %c0_16 = arith.constant 0 : index
    %c0_17 = arith.constant 0 : index
    %24 = vector.load %arg1[%c1, %c0_16, %c0_17] : memref<4x16x128xf32, #tpu.memory_space<vmem>>, vector<1x16x128xf32>
    %25 = vector.shape_cast %24 : vector<1x16x128xf32> to vector<16x128xf32>
    %26 = vector.shape_cast %1 : vector<128xf32> to vector<1x128xf32>
    %27 = vector.broadcast %26 : vector<1x128xf32> to vector<16x128xf32>
    %28 = arith.mulf %25, %27 : vector<16x128xf32>
    %29 = vector.shape_cast %3 : vector<128xf32> to vector<1x128xf32>
    %30 = vector.broadcast %29 : vector<1x128xf32> to vector<16x128xf32>
    %31 = arith.addf %28, %30 : vector<16x128xf32>
    %cst_18 = arith.constant 0.000000e+00 : f32
    %32 = vector.broadcast %cst_18 : f32 to vector<16x128xf32>
    %33 = arith.maximumf %31, %32 : vector<16x128xf32>
    %34 = arith.truncf %33 : vector<16x128xf32> to vector<16x128xbf16>
    %c48 = arith.constant 48 : index
    %c0_19 = arith.constant 0 : index
    %35 = vector.load %arg9[%c48, %c0_19] : memref<160x128xbf16, #tpu.memory_space<vmem>>, vector<16x128xbf16>
    tpu.vector_store %arg9[%c48, %c0_19], %34 {strides = array<i32>} : memref<160x128xbf16, #tpu.memory_space<vmem>>, vector<16x128xbf16>,
    %c64 = arith.constant 64 : index
    %c0_20 = arith.constant 0 : index
    %36 = vector.load %arg9[%c64, %c0_20] : memref<160x128xbf16, #tpu.memory_space<vmem>>, vector<16x128xbf16>
    tpu.vector_store %arg9[%c64, %c0_20], %8 {strides = array<i32>} : memref<160x128xbf16, #tpu.memory_space<vmem>>, vector<16x128xbf16>,
    %c2 = arith.constant 2 : index
    %c0_21 = arith.constant 0 : index
    %c0_22 = arith.constant 0 : index
    %37 = vector.load %arg1[%c2, %c0_21, %c0_22] : memref<4x16x128xf32, #tpu.memory_space<vmem>>, vector<1x16x128xf32>
    %38 = vector.shape_cast %37 : vector<1x16x128xf32> to vector<16x128xf32>
    %39 = vector.shape_cast %1 : vector<128xf32> to vector<1x128xf32>
    %40 = vector.broadcast %39 : vector<1x128xf32> to vector<16x128xf32>
    %41 = arith.mulf %38, %40 : vector<16x128xf32>
    %42 = vector.shape_cast %3 : vector<128xf32> to vector<1x128xf32>
    %43 = vector.broadcast %42 : vector<1x128xf32> to vector<16x128xf32>
    %44 = arith.addf %41, %43 : vector<16x128xf32>
    %cst_23 = arith.constant 0.000000e+00 : f32
    %45 = vector.broadcast %cst_23 : f32 to vector<16x128xf32>
    %46 = arith.maximumf %44, %45 : vector<16x128xf32>
    %47 = arith.truncf %46 : vector<16x128xf32> to vector<16x128xbf16>
    %c80 = arith.constant 80 : index
    %c0_24 = arith.constant 0 : index
    %48 = vector.load %arg9[%c80, %c0_24] : memref<160x128xbf16, #tpu.memory_space<vmem>>, vector<16x128xbf16>
    tpu.vector_store %arg9[%c80, %c0_24], %47 {strides = array<i32>} : memref<160x128xbf16, #tpu.memory_space<vmem>>, vector<16x128xbf16>,
    %c96 = arith.constant 96 : index
    %c0_25 = arith.constant 0 : index
    %49 = vector.load %arg9[%c96, %c0_25] : memref<160x128xbf16, #tpu.memory_space<vmem>>, vector<16x128xbf16>
    tpu.vector_store %arg9[%c96, %c0_25], %8 {strides = array<i32>} : memref<160x128xbf16, #tpu.memory_space<vmem>>, vector<16x128xbf16>,
    %c3 = arith.constant 3 : index
    %c0_26 = arith.constant 0 : index
    %c0_27 = arith.constant 0 : index
    %50 = vector.load %arg1[%c3, %c0_26, %c0_27] : memref<4x16x128xf32, #tpu.memory_space<vmem>>, vector<1x16x128xf32>
    %51 = vector.shape_cast %50 : vector<1x16x128xf32> to vector<16x128xf32>
    %52 = vector.shape_cast %1 : vector<128xf32> to vector<1x128xf32>
    %53 = vector.broadcast %52 : vector<1x128xf32> to vector<16x128xf32>
    %54 = arith.mulf %51, %53 : vector<16x128xf32>
    %55 = vector.shape_cast %3 : vector<128xf32> to vector<1x128xf32>
    %56 = vector.broadcast %55 : vector<1x128xf32> to vector<16x128xf32>
    %57 = arith.addf %54, %56 : vector<16x128xf32>
    %cst_28 = arith.constant 0.000000e+00 : f32
    %58 = vector.broadcast %cst_28 : f32 to vector<16x128xf32>
    %59 = arith.maximumf %57, %58 : vector<16x128xf32>
    %60 = arith.truncf %59 : vector<16x128xf32> to vector<16x128xbf16>
    %c112 = arith.constant 112 : index
    %c0_29 = arith.constant 0 : index
    %61 = vector.load %arg9[%c112, %c0_29] : memref<160x128xbf16, #tpu.memory_space<vmem>>, vector<16x128xbf16>
    tpu.vector_store %arg9[%c112, %c0_29], %60 {strides = array<i32>} : memref<160x128xbf16, #tpu.memory_space<vmem>>, vector<16x128xbf16>,
    %c128 = arith.constant 128 : index
    %c0_30 = arith.constant 0 : index
    %62 = vector.load %arg9[%c128, %c0_30] : memref<160x128xbf16, #tpu.memory_space<vmem>>, vector<16x128xbf16>
    tpu.vector_store %arg9[%c128, %c0_30], %8 {strides = array<i32>} : memref<160x128xbf16, #tpu.memory_space<vmem>>, vector<16x128xbf16>,
    %c15 = arith.constant 15 : index
    %c0_31 = arith.constant 0 : index
    %63 = vector.load %arg9[%c15, %c0_31] : memref<160x128xbf16, #tpu.memory_space<vmem>>, vector<128x128xbf16>
    %c0_32 = arith.constant 0 : index
    %c0_33 = arith.constant 0 : index
    %c0_34 = arith.constant 0 : index
    %64 = vector.load %arg4[%c0_32, %c0_33, %c0_34] : memref<3x128x128xbf16, #tpu.memory_space<vmem>>, vector<1x128x128xbf16>
    %65 = vector.shape_cast %64 : vector<1x128x128xbf16> to vector<128x128xbf16>
    %cst_35 = arith.constant dense<0.000000e+00> : vector<128x128xf32>
    %66 = tpu.matmul %63, %65, %cst_35 {dimension_numbers = #tpu.dot_dimension_numbers<[1], [0], [0], [1], [0, 0, 1, 1], [], []>} : vector<128x128xbf16>, vector<128x128xbf16>, vector<128x128xf32> -> vector<128x128xf32>
    %c16_36 = arith.constant 16 : index
    %c0_37 = arith.constant 0 : index
    %67 = vector.load %arg9[%c16_36, %c0_37] : memref<160x128xbf16, #tpu.memory_space<vmem>>, vector<128x128xbf16>
    %c1_38 = arith.constant 1 : index
    %c0_39 = arith.constant 0 : index
    %c0_40 = arith.constant 0 : index
    %68 = vector.load %arg4[%c1_38, %c0_39, %c0_40] : memref<3x128x128xbf16, #tpu.memory_space<vmem>>, vector<1x128x128xbf16>
    %69 = vector.shape_cast %68 : vector<1x128x128xbf16> to vector<128x128xbf16>
    %cst_41 = arith.constant dense<0.000000e+00> : vector<128x128xf32>
    %70 = tpu.matmul %67, %69, %cst_41 {dimension_numbers = #tpu.dot_dimension_numbers<[1], [0], [0], [1], [0, 0, 1, 1], [], []>} : vector<128x128xbf16>, vector<128x128xbf16>, vector<128x128xf32> -> vector<128x128xf32>
    %71 = arith.addf %66, %70 : vector<128x128xf32>
    %c17 = arith.constant 17 : index
    %c0_42 = arith.constant 0 : index
    %72 = vector.load %arg9[%c17, %c0_42] : memref<160x128xbf16, #tpu.memory_space<vmem>>, vector<128x128xbf16>
    %c2_43 = arith.constant 2 : index
    %c0_44 = arith.constant 0 : index
    %c0_45 = arith.constant 0 : index
    %73 = vector.load %arg4[%c2_43, %c0_44, %c0_45] : memref<3x128x128xbf16, #tpu.memory_space<vmem>>, vector<1x128x128xbf16>
    %74 = vector.shape_cast %73 : vector<1x128x128xbf16> to vector<128x128xbf16>
    %cst_46 = arith.constant dense<0.000000e+00> : vector<128x128xf32>
    %75 = tpu.matmul %72, %74, %cst_46 {dimension_numbers = #tpu.dot_dimension_numbers<[1], [0], [0], [1], [0, 0, 1, 1], [], []>} : vector<128x128xbf16>, vector<128x128xbf16>, vector<128x128xf32> -> vector<128x128xf32>
    %76 = arith.addf %71, %75 : vector<128x128xf32>
    %c0_47 = arith.constant 0 : index
    %c0_48 = arith.constant 0 : index
    %77 = vector.load %arg10[%c0_47, %c0_48] : memref<128x128xf32, #tpu.memory_space<vmem>>, vector<128x128xf32>
    tpu.vector_store %arg10[%c0_47, %c0_48], %76 {strides = array<i32>} : memref<128x128xf32, #tpu.memory_space<vmem>>, vector<128x128xf32>,
    %c0_49 = arith.constant 0 : index
    %c0_50 = arith.constant 0 : index
    %78 = vector.load %arg10[%c0_49, %c0_50] : memref<128x128xf32, #tpu.memory_space<vmem>>, vector<16x128xf32>
    %79 = vector.shape_cast %5 : vector<128xf32> to vector<1x128xf32>
    %80 = vector.broadcast %79 : vector<1x128xf32> to vector<16x128xf32>
    %81 = arith.mulf %78, %80 : vector<16x128xf32>
    %82 = vector.shape_cast %7 : vector<128xf32> to vector<1x128xf32>
    %83 = vector.broadcast %82 : vector<1x128xf32> to vector<16x128xf32>
    %84 = arith.addf %81, %83 : vector<16x128xf32>
    %cst_51 = arith.constant 0.000000e+00 : f32
    %85 = vector.broadcast %cst_51 : f32 to vector<16x128xf32>
    %86 = arith.maximumf %84, %85 : vector<16x128xf32>
    %87 = arith.truncf %86 : vector<16x128xf32> to vector<16x128xbf16>
    %c16_52 = arith.constant 16 : index
    %c0_53 = arith.constant 0 : index
    %88 = vector.load %arg9[%c16_52, %c0_53] : memref<160x128xbf16, #tpu.memory_space<vmem>>, vector<16x128xbf16>
    tpu.vector_store %arg9[%c16_52, %c0_53], %87 {strides = array<i32>} : memref<160x128xbf16, #tpu.memory_space<vmem>>, vector<16x128xbf16>,
    %c32_54 = arith.constant 32 : index
    %c0_55 = arith.constant 0 : index
    %89 = vector.load %arg10[%c32_54, %c0_55] : memref<128x128xf32, #tpu.memory_space<vmem>>, vector<16x128xf32>
    %90 = vector.shape_cast %5 : vector<128xf32> to vector<1x128xf32>
    %91 = vector.broadcast %90 : vector<1x128xf32> to vector<16x128xf32>
    %92 = arith.mulf %89, %91 : vector<16x128xf32>
    %93 = vector.shape_cast %7 : vector<128xf32> to vector<1x128xf32>
    %94 = vector.broadcast %93 : vector<1x128xf32> to vector<16x128xf32>
    %95 = arith.addf %92, %94 : vector<16x128xf32>
    %cst_56 = arith.constant 0.000000e+00 : f32
    %96 = vector.broadcast %cst_56 : f32 to vector<16x128xf32>
    %97 = arith.maximumf %95, %96 : vector<16x128xf32>
    %98 = arith.truncf %97 : vector<16x128xf32> to vector<16x128xbf16>
    %c48_57 = arith.constant 48 : index
    %c0_58 = arith.constant 0 : index
    %99 = vector.load %arg9[%c48_57, %c0_58] : memref<160x128xbf16, #tpu.memory_space<vmem>>, vector<16x128xbf16>
    tpu.vector_store %arg9[%c48_57, %c0_58], %98 {strides = array<i32>} : memref<160x128xbf16, #tpu.memory_space<vmem>>, vector<16x128xbf16>,
    %c64_59 = arith.constant 64 : index
    %c0_60 = arith.constant 0 : index
    %100 = vector.load %arg10[%c64_59, %c0_60] : memref<128x128xf32, #tpu.memory_space<vmem>>, vector<16x128xf32>
    %101 = vector.shape_cast %5 : vector<128xf32> to vector<1x128xf32>
    %102 = vector.broadcast %101 : vector<1x128xf32> to vector<16x128xf32>
    %103 = arith.mulf %100, %102 : vector<16x128xf32>
    %104 = vector.shape_cast %7 : vector<128xf32> to vector<1x128xf32>
    %105 = vector.broadcast %104 : vector<1x128xf32> to vector<16x128xf32>
    %106 = arith.addf %103, %105 : vector<16x128xf32>
    %cst_61 = arith.constant 0.000000e+00 : f32
    %107 = vector.broadcast %cst_61 : f32 to vector<16x128xf32>
    %108 = arith.maximumf %106, %107 : vector<16x128xf32>
    %109 = arith.truncf %108 : vector<16x128xf32> to vector<16x128xbf16>
    %c80_62 = arith.constant 80 : index
    %c0_63 = arith.constant 0 : index
    %110 = vector.load %arg9[%c80_62, %c0_63] : memref<160x128xbf16, #tpu.memory_space<vmem>>, vector<16x128xbf16>
    tpu.vector_store %arg9[%c80_62, %c0_63], %109 {strides = array<i32>} : memref<160x128xbf16, #tpu.memory_space<vmem>>, vector<16x128xbf16>,
    %c96_64 = arith.constant 96 : index
    %c0_65 = arith.constant 0 : index
    %111 = vector.load %arg10[%c96_64, %c0_65] : memref<128x128xf32, #tpu.memory_space<vmem>>, vector<16x128xf32>
    %112 = vector.shape_cast %5 : vector<128xf32> to vector<1x128xf32>
    %113 = vector.broadcast %112 : vector<1x128xf32> to vector<16x128xf32>
    %114 = arith.mulf %111, %113 : vector<16x128xf32>
    %115 = vector.shape_cast %7 : vector<128xf32> to vector<1x128xf32>
    %116 = vector.broadcast %115 : vector<1x128xf32> to vector<16x128xf32>
    %117 = arith.addf %114, %116 : vector<16x128xf32>
    %cst_66 = arith.constant 0.000000e+00 : f32
    %118 = vector.broadcast %cst_66 : f32 to vector<16x128xf32>
    %119 = arith.maximumf %117, %118 : vector<16x128xf32>
    %120 = arith.truncf %119 : vector<16x128xf32> to vector<16x128xbf16>
    %c112_67 = arith.constant 112 : index
    %c0_68 = arith.constant 0 : index
    %121 = vector.load %arg9[%c112_67, %c0_68] : memref<160x128xbf16, #tpu.memory_space<vmem>>, vector<16x128xbf16>
    tpu.vector_store %arg9[%c112_67, %c0_68], %120 {strides = array<i32>} : memref<160x128xbf16, #tpu.memory_space<vmem>>, vector<16x128xbf16>,
    %c15_69 = arith.constant 15 : index
    %c0_70 = arith.constant 0 : index
    %122 = vector.load %arg9[%c15_69, %c0_70] : memref<160x128xbf16, #tpu.memory_space<vmem>>, vector<128x128xbf16>
    %c0_71 = arith.constant 0 : index
    %c0_72 = arith.constant 0 : index
    %c0_73 = arith.constant 0 : index
    %123 = vector.load %arg7[%c0_71, %c0_72, %c0_73] : memref<3x128x128xbf16, #tpu.memory_space<vmem>>, vector<1x128x128xbf16>
    %124 = vector.shape_cast %123 : vector<1x128x128xbf16> to vector<128x128xbf16>
    %cst_74 = arith.constant dense<0.000000e+00> : vector<128x128xf32>
    %125 = tpu.matmul %122, %124, %cst_74 {dimension_numbers = #tpu.dot_dimension_numbers<[1], [0], [0], [1], [0, 0, 1, 1], [], []>} : vector<128x128xbf16>, vector<128x128xbf16>, vector<128x128xf32> -> vector<128x128xf32>
    %c16_75 = arith.constant 16 : index
    %c0_76 = arith.constant 0 : index
    %126 = vector.load %arg9[%c16_75, %c0_76] : memref<160x128xbf16, #tpu.memory_space<vmem>>, vector<128x128xbf16>
    %c1_77 = arith.constant 1 : index
    %c0_78 = arith.constant 0 : index
    %c0_79 = arith.constant 0 : index
    %127 = vector.load %arg7[%c1_77, %c0_78, %c0_79] : memref<3x128x128xbf16, #tpu.memory_space<vmem>>, vector<1x128x128xbf16>
    %128 = vector.shape_cast %127 : vector<1x128x128xbf16> to vector<128x128xbf16>
    %cst_80 = arith.constant dense<0.000000e+00> : vector<128x128xf32>
    %129 = tpu.matmul %126, %128, %cst_80 {dimension_numbers = #tpu.dot_dimension_numbers<[1], [0], [0], [1], [0, 0, 1, 1], [], []>} : vector<128x128xbf16>, vector<128x128xbf16>, vector<128x128xf32> -> vector<128x128xf32>
    %130 = arith.addf %125, %129 : vector<128x128xf32>
    %c17_81 = arith.constant 17 : index
    %c0_82 = arith.constant 0 : index
    %131 = vector.load %arg9[%c17_81, %c0_82] : memref<160x128xbf16, #tpu.memory_space<vmem>>, vector<128x128xbf16>
    %c2_83 = arith.constant 2 : index
    %c0_84 = arith.constant 0 : index
    %c0_85 = arith.constant 0 : index
    %132 = vector.load %arg7[%c2_83, %c0_84, %c0_85] : memref<3x128x128xbf16, #tpu.memory_space<vmem>>, vector<1x128x128xbf16>
    %133 = vector.shape_cast %132 : vector<1x128x128xbf16> to vector<128x128xbf16>
    %cst_86 = arith.constant dense<0.000000e+00> : vector<128x128xf32>
    %134 = tpu.matmul %131, %133, %cst_86 {dimension_numbers = #tpu.dot_dimension_numbers<[1], [0], [0], [1], [0, 0, 1, 1], [], []>} : vector<128x128xbf16>, vector<128x128xbf16>, vector<128x128xf32> -> vector<128x128xf32>
    %135 = arith.addf %130, %134 : vector<128x128xf32>
    %c0_87 = arith.constant 0 : index
    %c0_88 = arith.constant 0 : index
    %136 = vector.load %arg10[%c0_87, %c0_88] : memref<128x128xf32, #tpu.memory_space<vmem>>, vector<128x128xf32>
    tpu.vector_store %arg10[%c0_87, %c0_88], %135 {strides = array<i32>} : memref<128x128xf32, #tpu.memory_space<vmem>>, vector<128x128xf32>,
    %c0_89 = arith.constant 0 : index
    %c0_90 = arith.constant 0 : index
    %137 = vector.load %arg10[%c0_89, %c0_90] : memref<128x128xf32, #tpu.memory_space<vmem>>, vector<16x128xf32>
    %c0_91 = arith.constant 0 : index
    %c0_92 = arith.constant 0 : index
    %c0_93 = arith.constant 0 : index
    %138 = vector.load %arg1[%c0_91, %c0_92, %c0_93] : memref<4x16x128xf32, #tpu.memory_space<vmem>>, vector<1x16x128xf32>
    %139 = vector.shape_cast %138 : vector<1x16x128xf32> to vector<16x128xf32>
    %140 = arith.addf %137, %139 : vector<16x128xf32>
    %c0_94 = arith.constant 0 : index
    %c0_95 = arith.constant 0 : index
    %c0_96 = arith.constant 0 : index
    %141 = vector.load %arg8[%c0_94, %c0_95, %c0_96] : memref<4x16x128xf32, #tpu.memory_space<vmem>>, vector<1x16x128xf32>
    %142 = vector.shape_cast %141 : vector<1x16x128xf32> to vector<16x128xf32>
    %143 = vector.shape_cast %140 : vector<16x128xf32> to vector<1x16x128xf32>
    tpu.vector_store %arg8[%c0_94, %c0_95, %c0_96], %143 {strides = array<i32>} : memref<4x16x128xf32, #tpu.memory_space<vmem>>, vector<1x16x128xf32>,
    %c32_97 = arith.constant 32 : index
    %c0_98 = arith.constant 0 : index
    %144 = vector.load %arg10[%c32_97, %c0_98] : memref<128x128xf32, #tpu.memory_space<vmem>>, vector<16x128xf32>
    %c1_99 = arith.constant 1 : index
    %c0_100 = arith.constant 0 : index
    %c0_101 = arith.constant 0 : index
    %145 = vector.load %arg1[%c1_99, %c0_100, %c0_101] : memref<4x16x128xf32, #tpu.memory_space<vmem>>, vector<1x16x128xf32>
    %146 = vector.shape_cast %145 : vector<1x16x128xf32> to vector<16x128xf32>
    %147 = arith.addf %144, %146 : vector<16x128xf32>
    %c1_102 = arith.constant 1 : index
    %c0_103 = arith.constant 0 : index
    %c0_104 = arith.constant 0 : index
    %148 = vector.load %arg8[%c1_102, %c0_103, %c0_104] : memref<4x16x128xf32, #tpu.memory_space<vmem>>, vector<1x16x128xf32>
    %149 = vector.shape_cast %148 : vector<1x16x128xf32> to vector<16x128xf32>
    %150 = vector.shape_cast %147 : vector<16x128xf32> to vector<1x16x128xf32>
    tpu.vector_store %arg8[%c1_102, %c0_103, %c0_104], %150 {strides = array<i32>} : memref<4x16x128xf32, #tpu.memory_space<vmem>>, vector<1x16x128xf32>,
    %c64_105 = arith.constant 64 : index
    %c0_106 = arith.constant 0 : index
    %151 = vector.load %arg10[%c64_105, %c0_106] : memref<128x128xf32, #tpu.memory_space<vmem>>, vector<16x128xf32>
    %c2_107 = arith.constant 2 : index
    %c0_108 = arith.constant 0 : index
    %c0_109 = arith.constant 0 : index
    %152 = vector.load %arg1[%c2_107, %c0_108, %c0_109] : memref<4x16x128xf32, #tpu.memory_space<vmem>>, vector<1x16x128xf32>
    %153 = vector.shape_cast %152 : vector<1x16x128xf32> to vector<16x128xf32>
    %154 = arith.addf %151, %153 : vector<16x128xf32>
    %c2_110 = arith.constant 2 : index
    %c0_111 = arith.constant 0 : index
    %c0_112 = arith.constant 0 : index
    %155 = vector.load %arg8[%c2_110, %c0_111, %c0_112] : memref<4x16x128xf32, #tpu.memory_space<vmem>>, vector<1x16x128xf32>
    %156 = vector.shape_cast %155 : vector<1x16x128xf32> to vector<16x128xf32>
    %157 = vector.shape_cast %154 : vector<16x128xf32> to vector<1x16x128xf32>
    tpu.vector_store %arg8[%c2_110, %c0_111, %c0_112], %157 {strides = array<i32>} : memref<4x16x128xf32, #tpu.memory_space<vmem>>, vector<1x16x128xf32>,
    %c96_113 = arith.constant 96 : index
    %c0_114 = arith.constant 0 : index
    %158 = vector.load %arg10[%c96_113, %c0_114] : memref<128x128xf32, #tpu.memory_space<vmem>>, vector<16x128xf32>
    %c3_115 = arith.constant 3 : index
    %c0_116 = arith.constant 0 : index
    %c0_117 = arith.constant 0 : index
    %159 = vector.load %arg1[%c3_115, %c0_116, %c0_117] : memref<4x16x128xf32, #tpu.memory_space<vmem>>, vector<1x16x128xf32>
    %160 = vector.shape_cast %159 : vector<1x16x128xf32> to vector<16x128xf32>
    %161 = arith.addf %158, %160 : vector<16x128xf32>
    %c3_118 = arith.constant 3 : index
    %c0_119 = arith.constant 0 : index
    %c0_120 = arith.constant 0 : index
    %162 = vector.load %arg8[%c3_118, %c0_119, %c0_120] : memref<4x16x128xf32, #tpu.memory_space<vmem>>, vector<1x16x128xf32>
    %163 = vector.shape_cast %162 : vector<1x16x128xf32> to vector<16x128xf32>
    %164 = vector.shape_cast %161 : vector<16x128xf32> to vector<1x16x128xf32>
    tpu.vector_store %arg8[%c3_118, %c0_119, %c0_120], %164 {strides = array<i32>} : memref<4x16x128xf32, #tpu.memory_space<vmem>>, vector<1x16x128xf32>,
    return
  }
  func.func @transform_0(%arg0: i32) -> (i32, i32, i32) {
    %c0_i32 = arith.constant 0 : i32
    %c0_i32_0 = arith.constant 0 : i32
    %c0_i32_1 = arith.constant 0 : i32
    return %arg0, %c0_i32, %c0_i32_0 : i32, i32, i32
  }
  func.func @transform_1(%arg0: i32) -> (i32, i32) {
    %c0_i32 = arith.constant 0 : i32
    %c0_i32_0 = arith.constant 0 : i32
    %c0_i32_1 = arith.constant 0 : i32
    return %c0_i32, %c0_i32_0 : i32, i32
  }
  func.func @transform_2(%arg0: i32) -> (i32, i32) {
    %c0_i32 = arith.constant 0 : i32
    %c0_i32_0 = arith.constant 0 : i32
    %c0_i32_1 = arith.constant 0 : i32
    return %c0_i32, %c0_i32_0 : i32, i32
  }
  func.func @transform_3(%arg0: i32) -> (i32, i32, i32) {
    %c0_i32 = arith.constant 0 : i32
    %c0_i32_0 = arith.constant 0 : i32
    %c0_i32_1 = arith.constant 0 : i32
    %c0_i32_2 = arith.constant 0 : i32
    return %c0_i32, %c0_i32_0, %c0_i32_1 : i32, i32, i32
  }
  func.func @transform_4(%arg0: i32) -> (i32, i32) {
    %c0_i32 = arith.constant 0 : i32
    %c0_i32_0 = arith.constant 0 : i32
    %c0_i32_1 = arith.constant 0 : i32
    return %c0_i32, %c0_i32_0 : i32, i32
  }
  func.func @transform_5(%arg0: i32) -> (i32, i32) {
    %c0_i32 = arith.constant 0 : i32
    %c0_i32_0 = arith.constant 0 : i32
    %c0_i32_1 = arith.constant 0 : i32
    return %c0_i32, %c0_i32_0 : i32, i32
  }
  func.func @transform_6(%arg0: i32) -> (i32, i32, i32) {
    %c0_i32 = arith.constant 0 : i32
    %c0_i32_0 = arith.constant 0 : i32
    %c0_i32_1 = arith.constant 0 : i32
    %c0_i32_2 = arith.constant 0 : i32
    return %c0_i32, %c0_i32_0, %c0_i32_1 : i32, i32, i32
  }
  func.func @transform_7(%arg0: i32) -> (i32, i32, i32) {
    %c0_i32 = arith.constant 0 : i32
    %c0_i32_0 = arith.constant 0 : i32
    %c0_i32_1 = arith.constant 0 : i32
    return %arg0, %c0_i32, %c0_i32_0 : i32, i32, i32
  }
}

</mosaic_0001>

<bundles_post_ra>
// kernel: tpu_custom_call.1
= control target key start
LH: loop header
LB: loop body
LE: loop exit
PB: predicated region body
PF: predicated region fallthrough
CT: control target
= control target key end

     0   :  { %s3265_s0 = inlined_call_operand.hbm [shape: f32[8,16,128], index: 0, kind: input, shape index: {}]   ;;  %s3266_s1 = inlined_call_operand.hbm [shape: f32[1,128], index: 1, kind: input, shape index: {}]   ;;  %s3267_s2 = inlined_call_operand.vmem [shape: f32[1,128], index: 2, kind: input, shape index: {}]   ;;  %s3268_s3 = inlined_call_operand.hbm [shape: bf16[3,128,128], index: 3, kind: input, shape index: {}]   ;;  %s3269_s4 = inlined_call_operand.vmem [shape: f32[1,128], index: 4, kind: input, shape index: {}]   ;;  %s3270_s5 = inlined_call_operand.vmem [shape: f32[1,128], index: 5, kind: input, shape index: {}]   ;;  %s3271_s6 = inlined_call_operand.hbm [shape: bf16[3,128,128], index: 6, kind: input, shape index: {}]   ;;  %s3272_s7 = inlined_call_operand.hbm [shape: f32[8,16,128], index: 7, kind: output, shape index: {}]  }
   0x1   :  { %3273 = sst [smem:[#allocation17_spill]] %s3266_s1 }
   0x2   :  { %12 = vsyncpa [#allocation5], 0 }
   0x3   :  { %14 = vsyncpa [#allocation5 + $0x1], 0 }
   0x4   :  { %15 = vsyncpa [#allocation8], 0 }
   0x5   :  { %16 = vsyncpa [#allocation11], 0 }
   0x6   :  { %17 = vsyncpa [#allocation6], 0 }
   0x7   :  { %19 = vsyncpa [#allocation6 + $0x1], 0  ;;  %s2930_s24 = smov 0   ;;  %s2932_s25 = smov 0  }
   0x8   :  { %s2934_s26 = smov 0   ;;  %s2936_s27 = smov 0  }
   0x9 LB: > { %s2951_s28 = sadd.s32 4294967295, %s2878_s27   ;;  %s1980_s29 = sadd.s32 4294967294, %s2878_s27   ;;  %s2878_s27 = sphi %s2936_s27, %s3285_s27   ;;  %s2874_s26 = sphi %s2934_s26, %s3284_s26   ;;  %s2870_s25 = sphi %s2932_s25, %s3283_s25   ;;  %s2866_s24 = sphi %s2930_s24, %s3282_s24  }
   0xa   : > { %p45_p0 = scmp.ne.s32.totalorder %s2870_s25, %s2866_s24  ;;  %p46_p1 = scmp.eq.s32.totalorder %s2951_s28, 0 }
   0xb   : > { %p195_p2 = scmp.eq.s32.totalorder %s2951_s28, 1  ;;  %p201_p3 = scmp.eq.s32.totalorder %s1980_s29, 1 }
   0xc   : > { %p2960_p4 = por %p46_p1, %p45_p0  ;;  %p1981_p5 = scmp.ge.s32.totalorder %s2878_s27, 1 }
   0xd   : > { %p2965_p6 = por %p201_p3, %p45_p0  ;;  %p208_p7 = scmp.lt.s32.totalorder %s2878_s27, 3 }
   0xe   : > { %s3276_s1 = sld [smem:[#allocation17_spill]]  ;;  %s2880_s13 = smov [#allocation7]  }
   0xf   : > { %p2973_p8 = pnand %p1981_p5, %p208_p7  ;;  %s222_s14 = sshll.u32 %s2880_s13, 4  ;;  %s223_s14 = int_to_ptr.vmem [resolvable:$true] %s222_s14 }
  0x10   : > { %s234_s17 = sshll.u32 %s3268_s3, 4  ;;  %s2881_s19 = smov [#allocation9]   ;;  %s235_s17 = int_to_ptr.hbm [resolvable:$true] %s234_s17 }
  0x11   : > { %p2612_p10 = pneg %p2973_p8  ;;  %s236_s20 = sshll.u32 %s2881_s19, 4  ;;  %s237_s20 = int_to_ptr.vmem [resolvable:$true] %s236_s20 }
  0x12   : > { %s2882_s21 = smov 64   ;;  %s2883_s22 = smov 4  }
  0x13   : > { %p2985_p11 = pnand %p2612_p10, %p46_p1  ;;  %s254_s9 = sshll.u32 %s3271_s6, 4  ;;  %s255_s9 = int_to_ptr.hbm [resolvable:$true] %s254_s9 }
  0x14   : > { %s220_s11 = sshll.u32 %s3276_s1, 4  ;;  %s2884_s10 = smov [#allocation10]   ;;  %s221_s11 = int_to_ptr.hbm [resolvable:$true] %s220_s11 }
  0x15   : > { %2615 = dma.hbm_to_vmem [thread:$0]  (!%p2985_p11), %s221_s11, 16, %s223_s14, [#allocation8]  }
  0x16   : > { %2618 = dma.hbm_to_vmem [thread:$0]  (!%p2985_p11), %s235_s17, 3072, %s237_s20, [#allocation8], %s2882_s21, %s2882_s21, %s2883_s22  }
  0x17   : > { %s256_s13 = sshll.u32 %s2884_s10, 4  ;;  %s2999_s11 = sadd.s32 1, %s2878_s27   ;;  %s257_s13 = int_to_ptr.vmem [resolvable:$true] %s256_s13 }
  0x18   : > { %2621 = dma.hbm_to_vmem [thread:$0]  (!%p2985_p11), %s255_s9, 3072, %s257_s13, [#allocation11], %s2882_s21, %s2882_s21, %s2883_s22  }
  0x19   : > { %s29_s14 = ssub.s32 %s2878_s27, %s2999_s11  ;;  %s32_s15 = sadd.s32 1, %s2874_s26 }
  0x1a   : > { %p30_p12 = scmp.eq.s32.totalorder %s29_s14, 0  ;;  %p39_p13 = scmp.ne.s32.totalorder %s2874_s26, %s2870_s25 }
  0x1b   : > { %p40_p0 = scmp.eq.s32.totalorder %s2878_s27, 0  ;;  %p2633_p3 = scmp.lt.s32.totalorder %s2878_s27, 2 }
  0x1c   : > { %s3009_s16 = scalar_select %p30_p12, %s2874_s26, %s32_s15  }
  0x1d   : > { %p41_p5 = por %p40_p0, %p39_p13  ;;  %p3013_p7 = por %p195_p2, %p39_p13 }
  0x1e   : > { %s270_s18 = sand.u32 1, %s2874_s26   ;;  %s2277_s19 = sshll.u32 %s2878_s27, 6 }
  0x1f   : > { %s1986_s20 = sshll.u32 %s270_s18, 6  ;;  %s280_s23 = scalar_lea.hbm %s3265_s0, %s2277_s19 }
  0x20   : > { %s281_s29 = sshll.u32 %s280_s23, 4  ;;  %s274_s9 = scalar_lea.vmem [#allocation4], %s1986_s20  ;;  %s282_s29 = int_to_ptr.hbm [resolvable:$true] %s281_s29 }
  0x21   : > { %s283_s10 = sshll.u32 %s274_s9, 4  ;;  %p3024_p10 = pnand %p2633_p3, %p41_p5  ;;  %s284_s10 = int_to_ptr.vmem [resolvable:$true] %s283_s10 }
  0x22   : > { %s271_s14 = scalar_lea.sflag [#allocation5], %s270_s18  ;;  %s2774_s15 = sshra.s32 %s282_s29, 4  ;;  %s2775_s15 = int_to_ptr.hbm [resolvable:$true] %s2774_s15 }
  0x23   : > { %s2776_s1 = scalar_lea.hbm %s2775_s15, 64  ;;  %p2778_p11 = pneg %p3024_p10 }
  0x24   : > { %p2777_p2 = scmp.ne.s32.totalorder %s2775_s15, %s2776_s1  ;;  %s2781_s21 = scalar_lea.hbm %s3265_s0, 128 }
  0x25   : > { %p2782_p0 = scmp.lt.s32.totalorder %s2775_s15, %s3265_s0  ;;  %p2783_p3 = scmp.lt.s32.totalorder %s2781_s21, %s2776_s1 }
  0x26   : > { %p2779_p12 = pnand %p2778_p11, %p2777_p2 }
  0x27   : > { %p2784_p5 = por %p2783_p3, %p2782_p0 }
  0x28   : > { %p2780_p13 = pneg %p2779_p12 }
  0x2a   : > { %p2785_p9 = pnand %p2784_p5, %p2780_p13 }
  0x2c   : > { %2788 = shalt.err (!%p2785_p9)
}
  0x2d   : > { %s2885_s18 = smov 128   ;;  %s2886_s9 = smov 8  }
  0x2e   : > { %2625 = dma.hbm_to_vmem [thread:$0]  (!%p3024_p10), %s282_s29, 1024, %s284_s10, %s271_s14, %s2885_s18, %s2885_s18, %s2886_s9  }
  0x2f   : > { %295 = sbr.rel (%p2973_p8) target bundleno = 581 (0x245), region = 48  ;;  %s3041_s19 = sand.u32 (!%p2973_p8), 1, %s2870_s25  }
  0x30   : > { %s1991_s15 = sshll.u32 (!%p2973_p8), %s3041_s19, 6  ;;  %s298_s1 = scalar_lea.sflag (!%p2973_p8), [#allocation5], %s3041_s19 }
  0x31   : > { %s3047_s20 = scalar_lea.vmem (!%p2973_p8), [#allocation4], %s1991_s15 }
  0x34   : > { %2849 = dma.done.wait (%p2960_p4), %s298_s1, 1024  }
  0x35   : > { %2851 = vsyncadd (%p2960_p4), %s298_s1, 4294966272 }
  0x36   : > { %2853 = dma.done.wait (%p46_p1), [#allocation8], 3088  }
  0x37   : > { %2855 = vsyncadd (%p46_p1), [#allocation8], 4294964208 }
  0x38   : > { %2857 = dma.done.wait (%p46_p1), [#allocation11], 3072  }
  0x39   : > { %2859 = vsyncadd (%p46_p1), [#allocation11], 4294964224  ;;  %v2887_v0 = vmov 0   ;;  %v2293_v1 = vld [vmem:[#allocation9 + $0x78] sm:$0xff]  ;;  %v2292_v3 = vld [vmem:[#allocation9 + $0x70] sm:$0xff]  ;;  %s3214_s21 = scalar_lea.vmem [#allocation12], %s1991_s15 }
  0x3a   : > { %393 = vst [vmem:[#allocation2 + $0x24] sm:$0xf] %v2887_v0  ;;  %v2285_v2 = vld [vmem:[#allocation9 + $0x38] sm:$0xff]  ;;  %2580 = vmatpush.bf16.msra.mxu2 %v2293_v1  ;;  %v2284_v4 = vld [vmem:[#allocation9 + $0x30] sm:$0xff]  ;;  %570 = vmatpush.bf16.msra.mxu0 %v2293_v1  ;;  %v2291_v5 = vld [vmem:[#allocation9 + $0x68] sm:$0xff]  ;;  %s2343_s22 = sshll.u32 %s2951_s28, 6 }
  0x3b   : > { %407 = vst [vmem:[#allocation2 + $0x30] sm:$0xf] %v2887_v0  ;;  %2588 = vmatpush.bf16.msra.mxu3 %v2285_v2  ;;  %767 = vmatpush.bf16.msra.mxu1 %v2285_v2  ;;  %v2283_v6 = vld [vmem:[#allocation9 + $0x28] sm:$0xff]  ;;  %v3061_v7 = vld [vmem:[#allocation7] ss:$0 sm:$0xff]  ;;  %v2001_v14 = vld [vmem:[%s3047_s20 + $0x38] sm:$0xff]  ;;  %s1874_s9 = scalar_lea.hbm %s3272_s7, %s2343_s22 }
  0x3c   : > { %356 = vst [vmem:[#allocation2 + $0x4] sm:$0xf] %v2887_v0  ;;  %v3066_v8 = vld [vmem:[%s3267_s2] ss:$0 sm:$0xff]  ;;  %v1998_v9 = vld [vmem:[%s3047_s20 + $0x20] sm:$0xff]  ;;  %v1999_v10 = vld [vmem:[%s3047_s20 + $0x28] sm:$0xff]  ;;  %v413_v16 = vmul.f32 %v3061_v7, %v2001_v14 }
  0x3d   : > { %357 = vst [vmem:[#allocation2 + $0x48] sm:$0xf] %v2887_v0  ;;  %v397_v11 = vmul.f32 %v3061_v7, %v1998_v9  ;;  %v398_v12 = vmul.f32 %v3061_v7, %v1999_v10  ;;  %v2000_v13 = vld [vmem:[%s3047_s20 + $0x30] sm:$0xff]  ;;  %v2290_v17 = vld [vmem:[#allocation9 + $0x60] sm:$0xff]  ;;  %v2289_v27 = vld [vmem:[#allocation9 + $0x58] sm:$0xff]  ;;  %s1875_s15 = sshll.u32 %s3214_s21, 4  ;;  %s1876_s15 = int_to_ptr.vmem [resolvable:$true] %s1875_s15 }
  0x3e   : > { %377 = vst [vmem:[#allocation2 + $0x10] sm:$0xf] %v2887_v0  ;;  %2581 = vmatpush.bf16.msra.mxu2 %v2292_v3  ;;  %571 = vmatpush.bf16.msra.mxu0 %v2292_v3  ;;  %v412_v15 = vmul.f32 %v3061_v7, %v2000_v13  ;;  %v2282_v18 = vld [vmem:[#allocation9 + $0x20] sm:$0xff]  ;;  %v415_v22 = vadd.f32 %v3066_v8, %v413_v16  ;;  %v2281_v28 = vld [vmem:[#allocation9 + $0x18] sm:$0xff]  ;;  %v2288_v31 = vld [vmem:[#allocation9 + $0x50] sm:$0xff]  ;;  %s1877_s1 = sshll.u32 %s1874_s9, 4  ;;  %s1878_s1 = int_to_ptr.hbm [resolvable:$true] %s1877_s1 }
  0x3f   : > { %378 = vst [vmem:[#allocation2 + $0x14] sm:$0xf] %v2887_v0  ;;  %2589 = vmatpush.bf16.msra.mxu3 %v2284_v4  ;;  %768 = vmatpush.bf16.msra.mxu1 %v2284_v4  ;;  %v399_v19 = vadd.f32 %v3066_v8, %v397_v11  ;;  %v400_v20 = vadd.f32 %v3066_v8, %v398_v12  ;;  %v2280_v32 = vld [vmem:[#allocation9 + $0x10] sm:$0xff]  ;;  %v2287_v33 = vld [vmem:[#allocation9 + $0x48] sm:$0xff]  ;;  %v2286_v41 = vld [vmem:[#allocation9 + $0x40] sm:$0xff]  ;;  %s1862_s28 = scalar_lea.sflag [#allocation6], %s3041_s19 }
  0x40   : > { %392 = vst [vmem:[#allocation2 + $0x20] sm:$0xf] %v2887_v0  ;;  %v414_v21 = vadd.f32 %v3066_v8, %v412_v15  ;;  %v417_v26 = vmax.f32 %v415_v22, 0.0  ;;  %v2279_v34 = vld [vmem:[#allocation9 + $0x8] sm:$0xff]  ;;  %v2278_v42 = vld [vmem:[#allocation9] sm:$0xff]  ;;  %v2309_v47 = vld [vmem:[#allocation9 + $0xb8] sm:$0xff] }
  0x41   : > { %408 = vst [vmem:[#allocation2 + $0x34] sm:$0xf] %v2887_v0  ;;  %v401_v23 = vmax.f32 %v399_v19, 0.0  ;;  %v402_v24 = vmax.f32 %v400_v20, 0.0  ;;  %vm630_vm0 = vsmask.f32 4352 }
  0x42   : > { %422 = vst [vmem:[#allocation2 + $0x40] sm:$0xf] %v2887_v0  ;;  %2582 = vmatpush.bf16.msra.mxu2 %v2291_v5  ;;  %572 = vmatpush.bf16.msra.mxu0 %v2291_v5  ;;  %v416_v25 = vmax.f32 %v414_v21, 0.0  ;;  %v2308_v52 = vld [vmem:[#allocation9 + $0xb0] sm:$0xff]  ;;  %v2307_v55 = vld [vmem:[#allocation9 + $0xa8] sm:$0xff]  ;;  %v359_v56 = vld [vmem:[%s3047_s20] sm:$0xff] }
  0x43   : > { %423 = vst [vmem:[#allocation2 + $0x44] sm:$0xf] %v2887_v0  ;;  %2590 = vmatpush.bf16.msra.mxu3 %v2283_v6  ;;  %769 = vmatpush.bf16.msra.mxu1 %v2283_v6  ;;  %v2357_v29 = vpack.c.bf16 %v402_v24, %v401_v23  ;;  %v360_v57 = vld [vmem:[%s3047_s20 + $0x8] sm:$0xff]  ;;  %v364_v58 = vmul.f32 %v3061_v7, %v359_v56  ;;  %v2305_v5 = vld [vmem:[#allocation9 + $0x98] sm:$0xff]  ;;  %v2304_v11 = vld [vmem:[#allocation9 + $0x90] sm:$0xff]  ;;  %s2818_s30 = sshra.s32 %s1878_s1, 4  ;;  %s2819_s30 = int_to_ptr.hbm [resolvable:$true] %s2818_s30 }
  0x44   : > { %v3080_v30 = vpack.c.bf16 %v417_v26, %v416_v25  ;;  %v365_v59 = vmul.f32 %v3061_v7, %v360_v57  ;;  %v2306_v0 = vld [vmem:[#allocation9 + $0xa0] sm:$0xff]  ;;  %v2462_v12 = vld [vmem:[#allocation2 + $0x4] sm:$0x8]  ;;  %v2303_v15 = vld [vmem:[#allocation9 + $0x88] sm:$0xff]  ;;  %vm893_vm1 = vsmask.f32 7424  ;;  %p2825_p9 = scmp.lt.s32.totalorder %s2819_s30, %s3272_s7 }
  0x45   : > { %2450 = vst [vmem:[#allocation2 + $0x28] sm:$0xff] %v2357_v29   ;;  %v369_v62 = vadd.f32 %v3066_v8, %v364_v58  ;;  %v3098_v19 = vld [vmem:[%s3047_s20 + $0x10] sm:$0xff]  ;;  %v1997_v22 = vld [vmem:[%s3047_s20 + $0x18] sm:$0xff]  ;;  %s2820_s12 = scalar_lea.hbm %s2819_s30, 64  ;;  %s2824_s13 = scalar_lea.hbm %s3272_s7, 128 }
  0x46   : > { %2583 = vmatpush.bf16.msra.mxu2 %v2290_v17  ;;  %573 = vmatpush.bf16.msra.mxu0 %v2290_v17  ;;  %2451 = vst [vmem:[#allocation2 + $0x38] sm:$0xff] %v3080_v30   ;;  %v370_v63 = vadd.f32 %v3066_v8, %v365_v59  ;;  %p2821_p1 = scmp.ne.s32.totalorder %s2819_s30, %s2820_s12  ;;  %p2826_p10 = scmp.lt.s32.totalorder %s2824_s13, %s2820_s12 }
  0x47   : > { %2591 = vmatpush.bf16.msra.mxu3 %v2282_v18  ;;  %770 = vmatpush.bf16.msra.mxu1 %v2282_v18  ;;  %v371_v1 = vmax.f32 %v369_v62, 0.0 }
  0x48   : > { %v372_v2 = vmax.f32 %v370_v63, 0.0  ;;  %v3093_v6 = vld [vmem:[#allocation2 + $0x30] sm:$0xff]   ;;  %p2822_p4 = pnand %p2821_p1, %p3013_p7  ;;  %p2827_p2 = por %p2826_p10, %p2825_p9 }
  0x4a   : > { %2584 = vmatpush.bf16.msra.mxu2 %v2289_v27  ;;  %574 = vmatpush.bf16.msra.mxu0 %v2289_v27  ;;  %v2347_v4 = vpack.c.bf16 %v372_v2, %v371_v1  ;;  %v2302_v27 = vld [vmem:[#allocation9 + $0x80] sm:$0xff]  ;;  %p2823_p8 = pneg %p2822_p4 }
  0x4b   : > { %2592 = vmatpush.bf16.msra.mxu3 %v2281_v28  ;;  %771 = vmatpush.bf16.msra.mxu1 %v2281_v28 }
  0x4c   : > { %v2559_v35 = vld [vmem:[#allocation2 + $0x24] sm:$0xff]   ;;  %v2561_v36 = vld [vmem:[#allocation2 + $0x2c] sm:$0xff]   ;;  %2448 = vst [vmem:[#allocation2 + $0x8] sm:$0xff] %v2347_v4   ;;  %p2828_p11 = pnand %p2827_p2, %p2823_p8 }
  0x4d   : > { %v667_v37 = vshrl.u32 %v2559_v35, 16  ;;  %v670_v38 = vshll.u32 %v2559_v35, 16  ;;  %v676_v39 = vshrl.u32 %v2561_v36, 16  ;;  %v679_v40 = vshll.u32 %v2561_v36, 16  ;;  %v2563_v50 = vld [vmem:[#allocation2 + $0x34] sm:$0xff]   ;;  %v2564_v10 = vld [vmem:[#allocation2 + $0x3c] sm:$0xff]  }
  0x4e   : > { %2585 = vmatpush.bf16.msra.mxu2 %v2288_v31  ;;  %575 = vmatpush.bf16.msra.mxu0 %v2288_v31  ;;  %v685_v53 = vshrl.u32 %v2563_v50, 16  ;;  %v688_v54 = vshll.u32 %v2563_v50, 16  ;;  %v694_v13 = vshrl.u32 %v2564_v10, 16  ;;  %v697_v14 = vshll.u32 %v2564_v10, 16 }
  0x4f   : > { %2593 = vmatpush.bf16.msra.mxu3 %v2280_v32  ;;  %772 = vmatpush.bf16.msra.mxu1 %v2280_v32  ;;  %v669_v43 = vrot.slane %v667_v37, 3  ;;  %v672_v44 = vrot.slane %v670_v38, 4  ;;  %v678_v45 = vrot.slane %v676_v39, 3  ;;  %v681_v46 = vrot.slane %v679_v40, 4 }
  0x50   : > { %v687_v60 = vrot.slane %v685_v53, 3  ;;  %v690_v61 = vrot.slane %v688_v54, 4  ;;  %v696_v23 = vrot.slane %v694_v13, 3  ;;  %v699_v24 = vrot.slane %v697_v14, 4  ;;  %v2295_v54 = vld [vmem:[#allocation2 + $0x10] sm:$0xff]  ;;  %v2297_v13 = vld [vmem:[#allocation2 + $0x20] sm:$0xff] }
  0x51   : > { %v3083_v48 = vor.u32 %v672_v44, %v669_v43  ;;  %v682_v49 = vor.u32 %v681_v46, %v678_v45  ;;  %v382_v31 = vmul.f32 %v3061_v7, %v3098_v19  ;;  %v902_v62 = vshll.u32 %v2295_v54, 16 }
  0x52   : > { %2586 = vmatpush.bf16.msra.mxu2 %v2287_v33  ;;  %576 = vmatpush.bf16.msra.mxu0 %v2287_v33  ;;  %v691_v3 = vor.u32 %v690_v61, %v687_v60  ;;  %v3105_v37 = vor.u32 %v699_v24, %v696_v23 }
  0x53   : > { %2594 = vmatpush.bf16.msra.mxu3 %v2279_v34  ;;  %773 = vmatpush.bf16.msra.mxu1 %v2279_v34  ;;  %v683_v51 = vsel %vm630_vm0, %v3083_v48, %v682_v49  ;;  %v2551_v16 = vld [vmem:[#allocation2 + $0x4] sm:$0xf0]   ;;  %v2553_v17 = vld [vmem:[#allocation2 + $0xc] sm:$0xff]   ;;  %v383_v34 = vmul.f32 %v3061_v7, %v1997_v22  ;;  %v384_v36 = vadd.f32 %v3066_v8, %v382_v31  ;;  %v904_v1 = vrot.slane %v902_v62, 1 }
  0x54   : > { %v692_v9 = vsel %vm630_vm0, %v682_v49, %v691_v3  ;;  %v2463_v18 = vor.u32 %v2551_v16, %v2462_v12  ;;  %v640_v20 = vshrl.u32 %v2553_v17, 16  ;;  %v643_v21 = vshll.u32 %v2553_v17, 16  ;;  %v3112_v7 = vld [vmem:[#allocation2 + $0x10] sm:$0xff]  }
  0x55   : > { %v385_v39 = vadd.f32 %v3066_v8, %v383_v34  ;;  %v386_v40 = vmax.f32 %v384_v36, 0.0  ;;  %v701_v43 = vsel %vm630_vm0, %v691_v3, %v3105_v37 }
  0x56   : > { %2587 = vmatpush.bf16.msra.mxu2 %v2286_v41  ;;  %577 = vmatpush.bf16.msra.mxu0 %v2286_v41  ;;  %v632_v25 = vshrl.u32 %v2463_v18, 16  ;;  %v635_v26 = vshll.u32 %v2463_v18, 16  ;;  %v642_v28 = vrot.slane %v640_v20, 3  ;;  %v2298_v20 = vld [vmem:[#allocation2 + $0x28] sm:$0xff] }
  0x57   : > { %2595 = vmatpush.bf16.msra.mxu3 %v2278_v42  ;;  %774 = vmatpush.bf16.msra.mxu1 %v2278_v42  ;;  %v387_v42 = vmax.f32 %v385_v39, 0.0  ;;  %v926_v22 = vshll.u32 %v2298_v20, 16 }
  0x58   : > { %v634_v32 = vrot.slane %v632_v25, 3  ;;  %v637_v33 = vrot.slane %v635_v26, 4  ;;  %v2299_v26 = vld [vmem:[#allocation2 + $0x30] sm:$0xff] }
  0x59   : > { %598 = vmatmul.bf16.vlgmr.msra.gmra.mxu2 %v2357_v29  ;;  %578 = vmatmul.bf16.vlgmr.msra.gmra.mxu0 %v2347_v4  ;;  %v645_v29 = vrot.slane %v643_v21, 4  ;;  %v2352_v44 = vpack.c.bf16 %v387_v42, %v386_v40  ;;  %v922_v21 = vshrl.u32 %v2297_v13, 16  ;;  %v928_v24 = vrot.slane %v926_v22, 1 }
  0x5a   : > { %1018 = vmatpush.bf16.msrb.mxu2 %v2309_v47  ;;  %795 = vmatmul.bf16.vlgmr.msra.gmra.mxu3 %v683_v51  ;;  %v638_v38 = vor.u32 %v637_v33, %v634_v32  ;;  %v3115_v51 = vld [vmem:[#allocation2 + $0x40] sm:$0xff]   ;;  %v2300_v33 = vld [vmem:[#allocation2 + $0x38] sm:$0xff] }
  0x5b   : > { %v646_v35 = vor.u32 %v645_v29, %v642_v28  ;;  %2449 = vst [vmem:[#allocation2 + $0x18] sm:$0xff] %v2352_v44   ;;  %v934_v28 = vshll.u32 %v2299_v26, 16  ;;  %v942_v39 = vshll.u32 %v2300_v33, 16 }
  0x5d   : > { %v647_v41 = vsel %vm630_vm0, %v638_v38, %v646_v35  ;;  %v936_v31 = vrot.slane %v934_v28, 1  ;;  %v938_v38 = vshrl.u32 %v2299_v26, 16  ;;  %v2338_v26 = vld [vmem:[#allocation10 + $0xa0] sm:$0xff] }
  0x5e   : > { %1019 = vmatpush.bf16.msrb.mxu2 %v2308_v52  ;;  %775 = vmatmul.bf16.vlgmr.msra.gmra.mxu1 %v647_v41  ;;  %v2294_v52 = vld [vmem:[#allocation2 + $0x8] sm:$0xff]  ;;  %v944_v41 = vrot.slane %v942_v39, 1  ;;  %v2314_v28 = vld [vmem:[#allocation10 + $0x20] sm:$0xff] }
  0x5f   : > { %v895_v60 = vshrl.u32 %v2294_v52, 16  ;;  %v940_v40 = vor.u32 %v938_v38, %v936_v31  ;;  %v2312_v38 = vld [vmem:[#allocation10 + $0x10] sm:$0xff] }
  0x62   : > { %1020 = vmatpush.bf16.msrb.mxu2 %v2307_v55  ;;  %v2555_v45 = vld [vmem:[#allocation2 + $0x14] sm:$0xff]   ;;  %v897_v55 = vshll.u32 %v2294_v52, 16  ;;  %v2317_v52 = vld [vmem:[#allocation10 + $0x38] sm:$0xff] }
  0x63   : > { %v649_v8 = vshrl.u32 %v2555_v45, 16  ;;  %v652_v46 = vshll.u32 %v2555_v45, 16  ;;  %v2296_v4 = vld [vmem:[#allocation2 + $0x18] sm:$0xff]  ;;  %v2325_v45 = vld [vmem:[#allocation10 + $0x78] sm:$0xff]  ;;  %1495 = vmatpush.bf16.msrb.mxu0 %v2317_v52 }
  0x64   : > { %v899_v61 = vrot.slane %v897_v55, 1  ;;  %v914_v14 = vshrl.u32 %v2296_v4, 16  ;;  %1299 = vmatpush.bf16.msrb.mxu3 %v2325_v45  ;;  %v946_v55 = vshrl.u32 %v2300_v33, 16  ;;  %v3154_v33 = vld [vmem:[#allocation2 + $0x20] sm:$0xff]  }
  0x65   : > { %v651_v47 = vrot.slane %v649_v8, 3  ;;  %v654_v49 = vrot.slane %v652_v46, 4  ;;  %v945_v8 = vsel %vm893_vm1, %v940_v40, %v944_v41  ;;  %v3133_v46 = vld [vmem:[#allocation2 + $0x40] sm:$0xff] }
  0x66   : > { %1021 = vmatpush.bf16.msrb.mxu2 %v2306_v0  ;;  %v900_v0 = vor.u32 %v899_v61, %v895_v60  ;;  %v2335_v40 = vld [vmem:[#allocation10 + $0x88] sm:$0xff] }
  0x67   : > { %v655_v50 = vor.u32 %v654_v49, %v651_v47  ;;  %v2395_v47 = vunpack.c.h.b16 %v3115_v51 }
  0x68   : > { %v905_v3 = vsel %vm893_vm1, %v900_v0, %v904_v1 }
  0x69   : > { %603 = vmatmul.bf16.gmra.mxu2 %v3093_v6  ;;  %583 = vmatmul.bf16.gmra.mxu0 %v3112_v7  ;;  %v656_v53 = vsel %vm630_vm0, %v646_v35, %v655_v50 }
  0x6a   : > { %1022 = vmatpush.bf16.msrb.mxu2 %v2305_v5  ;;  %800 = vmatmul.bf16.gmra.mxu3 %v692_v9  ;;  %v906_v5 = vshrl.u32 %v2295_v54, 16  ;;  %v910_v9 = vshll.u32 %v2296_v4, 16 }
  0x6c   : > { %v908_v10 = vor.u32 %v906_v5, %v904_v1  ;;  %v2316_v1 = vld [vmem:[#allocation10 + $0x30] sm:$0xff] }
  0x6d   : > { %1496 = vmatpush.bf16.msrb.mxu0 %v2316_v1 }
  0x6e   : > { %1023 = vmatpush.bf16.msrb.mxu2 %v2304_v11  ;;  %780 = vmatmul.bf16.gmra.mxu1 %v656_v53  ;;  %v912_v11 = vrot.slane %v910_v9, 1  ;;  %v2341_v53 = vld [vmem:[#allocation10 + $0xb8] sm:$0xff] }
  0x6f   : > { %1745 = vmatpush.bf16.msrb.mxu1 %v2341_v53 }
  0x70   : > { %v913_v12 = vsel %vm893_vm1, %v908_v10, %v912_v11  ;;  %v916_v16 = vor.u32 %v914_v14, %v912_v11  ;;  %v2322_v11 = vld [vmem:[#allocation10 + $0x60] sm:$0xff] }
  0x72   : > { %1024 = vmatpush.bf16.msrb.mxu2 %v2303_v15  ;;  %v918_v15 = vshll.u32 %v2297_v13, 16 }
  0x74   : > { %v920_v17 = vrot.slane %v918_v15, 1 }
  0x76   : > { %1025 = vmatpush.bf16.msrb.mxu2 %v2302_v27  ;;  %v921_v18 = vsel %vm893_vm1, %v916_v16, %v920_v17  ;;  %v924_v23 = vor.u32 %v922_v21, %v920_v17  ;;  %v930_v27 = vshrl.u32 %v2298_v20, 16  ;;  %v2321_v17 = vld [vmem:[#allocation10 + $0x58] sm:$0xff]  ;;  %v2315_v20 = vld [vmem:[#allocation10 + $0x28] sm:$0xff] }
  0x77   : > { %v2339_v21 = vld [vmem:[#allocation10 + $0xa8] sm:$0xff]  ;;  %1497 = vmatpush.bf16.msrb.mxu0 %v2315_v20 }
  0x78   : > { %v929_v25 = vsel %vm893_vm1, %v924_v23, %v928_v24  ;;  %v932_v29 = vor.u32 %v930_v27, %v928_v24  ;;  %v2318_v27 = vld [vmem:[#allocation10 + $0x40] sm:$0xff] }
  0x79   : > { %608 = vmatmul.bf16.gmra.mxu2 %v3080_v30  ;;  %v2557_v30 = vld [vmem:[#allocation2 + $0x1c] sm:$0xff]   ;;  %588 = vmatmul.bf16.gmra.mxu0 %v2352_v44 }
  0x7a   : > { %805 = vmatmul.bf16.gmra.mxu3 %v701_v43  ;;  %v658_v56 = vshrl.u32 %v2557_v30, 16  ;;  %v661_v57 = vshll.u32 %v2557_v30, 16  ;;  %v937_v32 = vsel %vm893_vm1, %v932_v29, %v936_v31  ;;  %v2324_v30 = vld [vmem:[#allocation10 + $0x70] sm:$0xff] }
  0x7b   : > { %1300 = vmatpush.bf16.msrb.mxu3 %v2324_v30  ;;  %1498 = vmatpush.bf16.msrb.mxu0 %v2314_v28 }
  0x7c   : > { %v660_v58 = vrot.slane %v658_v56, 3  ;;  %v663_v59 = vrot.slane %v661_v57, 4  ;;  %v950_v56 = vshll.u32 %v3133_v46, 16  ;;  %v629_v57 = vpack.c.b16 %v2395_v47, %v2395_v47 }
  0x7e   : > { %v3119_v63 = vor.u32 %v663_v59, %v660_v58  ;;  %v948_v58 = vor.u32 %v946_v55, %v944_v41  ;;  %v3139_v59 = vrot.slane %v950_v56, 1  ;;  %v706_v61 = vshll.u32 %v629_v57, 16  ;;  %v2311_v41 = vld [vmem:[#allocation10 + $0x8] sm:$0xff] }
  0x80   : > { %v665_v2 = vsel %vm630_vm0, %v655_v50, %v3119_v63  ;;  %v953_v5 = vsel %vm893_vm1, %v948_v58, %v3139_v59  ;;  %v708_v10 = vrot.slane %v706_v61, 4  ;;  %v674_v31 = vsel %vm630_vm0, %v3119_v63, %v3083_v48  ;;  %v2310_v63 = vld [vmem:[#allocation10] sm:$0xff] }
  0x81   : > { %785 = vmatmul.bf16.gmra.mxu1 %v665_v2  ;;  %v2340_v2 = vld [vmem:[#allocation10 + $0xb0] sm:$0xff] }
  0x82   : > { %1746 = vmatpush.bf16.msrb.mxu1 %v2340_v2 }
  0x86   : > { %1747 = vmatpush.bf16.msrb.mxu1 %v2339_v21 }
  0x89   : > { %613 = vmatmul.bf16.gmra.mxu2 %v3115_v51  ;;  %v703_v51 = vshrl.u32 %v629_v57, 16  ;;  %593 = vmatmul.bf16.gmra.mxu0 %v3154_v33 }
  0x8a   : > { %1748 = vmatpush.bf16.msrb.mxu1 %v2338_v26 }
  0x8b   : > { %v705_v9 = vrot.slane %v703_v51, 3  ;;  %v2327_v51 = vld [vmem:[#allocation2 + $0x10] sm:$0xff] }
  0x8d   : > { %v709_v14 = vor.u32 %v708_v10, %v705_v9 }
  0x8f   : > { %v710_v16 = vsel %vm630_vm0, %v3105_v37, %v709_v14 }
  0x90   : > { %810 = vmatmul.bf16.gmra.mxu3 %v710_v16 }
  0x91   : > { %790 = vmatmul.bf16.gmra.mxu1 %v674_v31 }
  0x99   : > { %1026 = vmatmul.bf16.vlgmr.msrb.gmra.mxu2 %v905_v3  ;;  %v2323_v3 = vld [vmem:[#allocation10 + $0x68] sm:$0xff] }
  0x9a   : > { %1301 = vmatpush.bf16.msrb.mxu3 %v2323_v3 }
  0x9e   : > { %1302 = vmatpush.bf16.msrb.mxu3 %v2322_v11 }
  0xa2   : > { %1303 = vmatpush.bf16.msrb.mxu3 %v2321_v17 }
  0xa9   : > { %1031 = vmatmul.bf16.gmra.mxu2 %v913_v12 }
  0xb9   : > { %1036 = vmatmul.bf16.gmra.mxu2 %v921_v18  ;;  %v2320_v18 = vld [vmem:[#allocation10 + $0x50] sm:$0xff] }
  0xba   : > { %1304 = vmatpush.bf16.msrb.mxu3 %v2320_v18 }
  0xc9   : > { %1041 = vmatmul.bf16.gmra.mxu2 %v929_v25  ;;  %v2319_v25 = vld [vmem:[#allocation10 + $0x48] sm:$0xff] }
  0xca   : > { %1305 = vmatpush.bf16.msrb.mxu3 %v2319_v25 }
  0xce   : > { %1306 = vmatpush.bf16.msrb.mxu3 %v2318_v27 }
  0xd6   : > { %v3136_v54 = vpop.f32.mrf.mxu0 }
  0xd9   : > { %1046 = vmatmul.bf16.gmra.mxu2 %v937_v32  ;;  %v2337_v32 = vld [vmem:[#allocation10 + $0x98] sm:$0xff] }
  0xda   : > { %1749 = vmatpush.bf16.msrb.mxu1 %v2337_v32 }
  0xdb   : > { %v3141_v60 = vpop.f32.mrf.mxu1 }
  0xdc   : > { %v599_v34 = vpop.f32.mrf.mxu2  ;;  %v777_v48 = vadd.f32 %v3141_v60, %v3136_v54 }
  0xdd   : > { %v796_v35 = vpop.f32.mrf.mxu3 }
  0xde   : > { %v3128_v36 = vadd.f32 %v796_v35, %v599_v34  ;;  %v581_v4 = vpop.f32.mrf.mxu0  ;;  %v2313_v34 = vld [vmem:[#allocation10 + $0x18] sm:$0xff]  ;;  %v2336_v35 = vld [vmem:[#allocation10 + $0x90] sm:$0xff] }
  0xdf   : > { %1499 = vmatpush.bf16.msrb.mxu0 %v2313_v34  ;;  %1750 = vmatpush.bf16.msrb.mxu1 %v2336_v35 }
  0xe3   : > { %v778_v12 = vpop.f32.mrf.mxu1  ;;  %1500 = vmatpush.bf16.msrb.mxu0 %v2312_v38  ;;  %1751 = vmatpush.bf16.msrb.mxu1 %v2335_v40 }
  0xe4   : > { %v601_v42 = vpop.f32.mrf.mxu2  ;;  %v779_v47 = vadd.f32 %v778_v12, %v581_v4 }
  0xe5   : > { %v798_v43 = vpop.f32.mrf.mxu3 }
  0xe6   : > { %v3130_v44 = vadd.f32 %v798_v43, %v601_v42  ;;  %v584_v15 = vpop.f32.mrf.mxu0  ;;  %v2334_v42 = vld [vmem:[#allocation10 + $0x80] sm:$0xff] }
  0xe7   : > { %1501 = vmatpush.bf16.msrb.mxu0 %v2311_v41  ;;  %1752 = vmatpush.bf16.msrb.mxu1 %v2334_v42 }
  0xe9   : > { %1051 = vmatmul.bf16.gmra.mxu2 %v945_v8  ;;  %v3162_v8 = vld [vmem:[%s3269_s4] ss:$0 sm:$0xff] }
  0xeb   : > { %v781_v23 = vpop.f32.mrf.mxu1  ;;  %1502 = vmatpush.bf16.msrb.mxu0 %v2310_v63 }
  0xec   : > { %v604_v49 = vpop.f32.mrf.mxu2 }
  0xed   : > { %v801_v50 = vpop.f32.mrf.mxu3 }
  0xee   : > { %v586_v24 = vpop.f32.mrf.mxu0  ;;  %v3168_v50 = vld [vmem:[%s3270_s5] ss:$0 sm:$0xff] }
  0xf3   : > { %v783_v37 = vpop.f32.mrf.mxu1 }
  0xf4   : > { %v606_v62 = vpop.f32.mrf.mxu2 }
  0xf5   : > { %v803_v0 = vpop.f32.mrf.mxu3  ;;  %v2513_v62 = vld [vmem:[#allocation2 + $0x4] sm:$0x8] }
  0xf6   : > { %v1629_v0 = vshll.u32 %v2327_v51, 16  ;;  %v589_v1 = vpop.f32.mrf.mxu0 }
  0xf8   : > { %v1631_v16 = vrot.slane %v1629_v0, 1 }
  0xf9   : > { %1056 = vmatmul.bf16.gmra.mxu2 %v953_v5 }
  0xfc   : > { %v3145_v13 = vpop.f32.mrf.mxu2 }
  0xfe   : > { %v786_v2 = vpop.f32.mrf.mxu1  ;;  %v591_v34 = vpop.f32.mrf.mxu0 }
  0xff   : > { %v787_v23 = vadd.f32 %v786_v2, %v589_v1 }
 0x104   : > { %v3149_v22 = vpop.f32.mrf.mxu2 }
 0x106   : > { %v788_v35 = vpop.f32.mrf.mxu1 }
 0x107   : > { %v789_v38 = vadd.f32 %v788_v35, %v591_v34 }
 0x10c   : > { %v614_v29 = vpop.f32.mrf.mxu2 }
 0x114   : > { %v616_v39 = vpop.f32.mrf.mxu2 }
 0x11c   : > { %v1027_v43 = vpop.f32.mrf.mxu2 }
 0x11d   : > { %v1067_v45 = vadd.f32 %v1027_v43, %v777_v48 }
 0x11f   : > { %v1104_v49 = vmul.f32 %v3162_v8, %v1067_v45 }
 0x121   : > { %v1109_v30 = vadd.f32 %v3168_v50, %v1104_v49 }
 0x123   : > { %v1111_v56 = vmax.f32 %v1109_v30, 0.0 }
 0x124   : > { %v1029_v52 = vpop.f32.mrf.mxu2 }
 0x125   : > { %v1068_v53 = vadd.f32 %v1029_v52, %v779_v47  ;;  %v1633_v52 = vshrl.u32 %v2327_v51, 16  ;;  %v2329_v51 = vld [vmem:[#allocation2 + $0x20] sm:$0xff] }
 0x127   : > { %v1105_v54 = vmul.f32 %v3162_v8, %v1068_v53 }
 0x129   : > { %v1110_v55 = vadd.f32 %v3168_v50, %v1105_v54  ;;  %v1635_v54 = vor.u32 %v1633_v52, %v1631_v16 }
 0x12b   : > { %v1112_v57 = vmax.f32 %v1110_v55, 0.0 }
 0x12c   : > { %v1032_v58 = vpop.f32.mrf.mxu2 }
 0x12d   : > { %v2399_v60 = vpack.c.bf16 %v1112_v57, %v1111_v56 }
 0x12f   : > { %2499 = vst [vmem:[#allocation2 + $0x8] sm:$0xff] %v2399_v60   ;;  %1307 = vmatmul.bf16.vlgmr.msrb.gmra.mxu3 %v2399_v60 }
 0x134   : > { %v1034_v61 = vpop.f32.mrf.mxu2 }
 0x136   : > { %v2566_v3 = vld [vmem:[#allocation2 + $0x4] sm:$0xf0]   ;;  %v2568_v4 = vld [vmem:[#allocation2 + $0xc] sm:$0xff]  }
 0x137   : > { %v2326_v5 = vld [vmem:[#allocation2 + $0x8] sm:$0xff]  ;;  %v2514_v9 = vor.u32 %v2566_v3, %v2513_v62  ;;  %v1368_v10 = vshrl.u32 %v2568_v4, 16  ;;  %v1371_v11 = vshll.u32 %v2568_v4, 16 }
 0x138   : > { %v1624_v12 = vshll.u32 %v2326_v5, 16  ;;  %v1622_v20 = vshrl.u32 %v2326_v5, 16 }
 0x139   : > { %v1360_v14 = vshrl.u32 %v2514_v9, 16  ;;  %v1363_v15 = vshll.u32 %v2514_v9, 16  ;;  %v1370_v17 = vrot.slane %v1368_v10, 3  ;;  %v1373_v18 = vrot.slane %v1371_v11, 4 }
 0x13a   : > { %v1626_v21 = vrot.slane %v1624_v12, 1  ;;  %v1645_v12 = vshll.u32 %v2329_v51, 16 }
 0x13b   : > { %v1362_v24 = vrot.slane %v1360_v14, 3  ;;  %v1365_v25 = vrot.slane %v1363_v15, 4  ;;  %v1374_v27 = vor.u32 %v1373_v18, %v1370_v17 }
 0x13c   : > { %v1037_v26 = vpop.f32.mrf.mxu2  ;;  %v1627_v28 = vor.u32 %v1626_v21, %v1622_v20  ;;  %v1647_v21 = vrot.slane %v1645_v12, 1 }
 0x13d   : > { %v1366_v29 = vor.u32 %v1365_v25, %v1362_v24  ;;  %v1071_v31 = vadd.f32 %v1037_v26, %v787_v23 }
 0x13e   : > { %v1632_v37 = vsel %vm893_vm1, %v1627_v28, %v1631_v16 }
 0x13f   : > { %v1375_v32 = vsel %vm630_vm0, %v1366_v29, %v1374_v27  ;;  %1753 = vmatmul.bf16.vlgmr.msrb.gmra.mxu1 %v1632_v37  ;;  %1312 = vmatmul.bf16.gmra.mxu3 %v3112_v7  ;;  %v1119_v39 = vmul.f32 %v3162_v8, %v1071_v31  ;;  %v806_v29 = vpop.f32.mrf.mxu3  ;;  %v1649_v31 = vshrl.u32 %v2329_v51, 16  ;;  %v832_v51 = vld [vmem:[#allocation2 + $0x48] sm:$0x1] }
 0x140   : > { %1503 = vmatmul.bf16.vlgmr.msrb.gmra.mxu0 %v1375_v32 }
 0x141   : > { %v1121_v42 = vadd.f32 %v3168_v50, %v1119_v39  ;;  %v1651_v35 = vor.u32 %v1649_v31, %v1647_v21 }
 0x143   : > { %v1123_v43 = vmax.f32 %v1121_v42, 0.0 }
 0x144   : > { %v1039_v40 = vpop.f32.mrf.mxu2 }
 0x145   : > { %v1072_v41 = vadd.f32 %v1039_v40, %v789_v38 }
 0x147   : > { %v1120_v48 = vmul.f32 %v3162_v8, %v1072_v41  ;;  %v808_v41 = vpop.f32.mrf.mxu3 }
 0x149   : > { %v1122_v63 = vadd.f32 %v3168_v50, %v1120_v48 }
 0x14b   : > { %v1124_v45 = vmax.f32 %v1122_v63, 0.0 }
 0x14c   : > { %v1042_v47 = vpop.f32.mrf.mxu2 }
 0x14d   : > { %v2404_v49 = vpack.c.bf16 %v1124_v45, %v1123_v43 }
 0x14f   : > { %2500 = vst [vmem:[#allocation2 + $0x18] sm:$0xff] %v2404_v49   ;;  %1317 = vmatmul.bf16.gmra.mxu3 %v2404_v49  ;;  %v807_v49 = vadd.f32 %v806_v29, %v3145_v13 }
 0x154   : > { %v1044_v7 = vpop.f32.mrf.mxu2 }
 0x156   : > { %v2328_v53 = vld [vmem:[#allocation2 + $0x18] sm:$0xff] }
 0x157   : > { %v2570_v30 = vld [vmem:[#allocation2 + $0x14] sm:$0xff]   ;;  %v1637_v55 = vshll.u32 %v2328_v53, 16  ;;  %v2572_v3 = vld [vmem:[#allocation2 + $0x1c] sm:$0xff]   ;;  %v1641_v15 = vshrl.u32 %v2328_v53, 16 }
 0x158   : > { %v1377_v56 = vshrl.u32 %v2570_v30, 16  ;;  %v1380_v57 = vshll.u32 %v2570_v30, 16  ;;  %v1386_v5 = vshrl.u32 %v2572_v3, 16  ;;  %v1389_v9 = vshll.u32 %v2572_v3, 16  ;;  %v2331_v30 = vld [vmem:[#allocation2 + $0x30] sm:$0xff] }
 0x159   : > { %v1639_v58 = vrot.slane %v1637_v55, 1 }
 0x15a   : > { %v1379_v60 = vrot.slane %v1377_v56, 3  ;;  %v1382_v61 = vrot.slane %v1380_v57, 4  ;;  %v1388_v16 = vrot.slane %v1386_v5, 3  ;;  %v1391_v17 = vrot.slane %v1389_v9, 4  ;;  %v811_v56 = vpop.f32.mrf.mxu3 }
 0x15b   : > { %v1640_v0 = vsel %vm893_vm1, %v1635_v54, %v1639_v58  ;;  %v809_v57 = vadd.f32 %v808_v41, %v3149_v22  ;;  %v883_v9 = vunpack.c.l.b16 %v832_v51 }
 0x15c   : > { %v1047_v62 = vpop.f32.mrf.mxu2  ;;  %v1383_v1 = vor.u32 %v1382_v61, %v1379_v60  ;;  %1758 = vmatmul.bf16.gmra.mxu1 %v1640_v0  ;;  %v1392_v23 = vor.u32 %v1391_v17, %v1388_v16  ;;  %v1661_v61 = vshll.u32 %v2331_v30, 16  ;;  %v791_v16 = vpop.f32.mrf.mxu1 }
 0x15d   : > { %v1075_v4 = vadd.f32 %v1047_v62, %v3128_v36  ;;  %v1643_v36 = vor.u32 %v1641_v15, %v1639_v58 }
 0x15e   : > { %v1384_v2 = vsel %vm630_vm0, %v1374_v27, %v1383_v1 }
 0x15f   : > { %1508 = vmatmul.bf16.gmra.mxu0 %v1384_v2  ;;  %1322 = vmatmul.bf16.gmra.mxu3 %v3154_v33  ;;  %v1131_v10 = vmul.f32 %v3162_v8, %v1075_v4  ;;  %v1648_v27 = vsel %vm893_vm1, %v1643_v36, %v1647_v21 }
 0x161   : > { %v1133_v18 = vadd.f32 %v3168_v50, %v1131_v10 }
 0x162   : > { %v813_v22 = vpop.f32.mrf.mxu3 }
 0x163   : > { %v1135_v24 = vmax.f32 %v1133_v18, 0.0  ;;  %v594_v18 = vpop.f32.mrf.mxu0 }
 0x164   : > { %v1049_v11 = vpop.f32.mrf.mxu2 }
 0x165   : > { %v1076_v14 = vadd.f32 %v1049_v11, %v3130_v44  ;;  %v1393_v44 = vsel %vm630_vm0, %v1383_v1, %v1392_v23 }
 0x167   : > { %v1132_v20 = vmul.f32 %v3162_v8, %v1076_v14  ;;  %v892_v14 = vpack.c.b16 %v883_v9, %v883_v9 }
 0x169   : > { %v1134_v33 = vadd.f32 %v3168_v50, %v1132_v20  ;;  %v954_v20 = vshrl.u32 %v3133_v46, 16 }
 0x16b   : > { %v1136_v25 = vmax.f32 %v1134_v33, 0.0 }
 0x16c   : > { %v1052_v26 = vpop.f32.mrf.mxu2  ;;  %1763 = vmatmul.bf16.gmra.mxu1 %v1648_v27 }
 0x16d   : > { %v2409_v28 = vpack.c.bf16 %v1136_v25, %v1135_v24  ;;  %v793_v24 = vpop.f32.mrf.mxu1  ;;  %v596_v25 = vpop.f32.mrf.mxu0 }
 0x16f   : > { %2501 = vst [vmem:[#allocation2 + $0x28] sm:$0xff] %v2409_v28   ;;  %1513 = vmatmul.bf16.gmra.mxu0 %v1393_v44  ;;  %1327 = vmatmul.bf16.gmra.mxu3 %v2409_v28 }
 0x174   : > { %v1054_v37 = vpop.f32.mrf.mxu2 }
 0x176   : > { %v2330_v32 = vld [vmem:[#allocation2 + $0x28] sm:$0xff] }
 0x177   : > { %v2574_v34 = vld [vmem:[#allocation2 + $0x24] sm:$0xff]   ;;  %v1653_v38 = vshll.u32 %v2330_v32, 16  ;;  %v2576_v52 = vld [vmem:[#allocation2 + $0x2c] sm:$0xff]   ;;  %v1657_v13 = vshrl.u32 %v2330_v32, 16 }
 0x178   : > { %v1395_v39 = vshrl.u32 %v2574_v34, 16  ;;  %v1398_v40 = vshll.u32 %v2574_v34, 16  ;;  %v1404_v54 = vshrl.u32 %v2576_v52, 16  ;;  %v1407_v55 = vshll.u32 %v2576_v52, 16 }
 0x179   : > { %v1655_v42 = vrot.slane %v1653_v38, 1 }
 0x17a   : > { %v1397_v48 = vrot.slane %v1395_v39, 3  ;;  %v1400_v63 = vrot.slane %v1398_v40, 4  ;;  %v1406_v0 = vrot.slane %v1404_v54, 3  ;;  %v1409_v1 = vrot.slane %v1407_v55, 4  ;;  %v2510_v39 = vld [vmem:[#allocation2 + $0x40] sm:$0xff]  }
 0x17b   : > { %v1656_v45 = vsel %vm893_vm1, %v1651_v35, %v1655_v42  ;;  %v1659_v4 = vor.u32 %v1657_v13, %v1655_v42  ;;  %v2333_v40 = vld [vmem:[#allocation2 + $0x40] sm:$0xff] }
 0x17c   : > { %v1057_v43 = vpop.f32.mrf.mxu2  ;;  %v1401_v47 = vor.u32 %v1400_v63, %v1397_v48  ;;  %1768 = vmatmul.bf16.gmra.mxu1 %v1656_v45  ;;  %v1410_v10 = vor.u32 %v1409_v1, %v1406_v0  ;;  %v1677_v48 = vshll.u32 %v2333_v40, 16 }
 0x17d   : > { %v1079_v53 = vadd.f32 %v1057_v43, %v807_v49 }
 0x17e   : > { %v1402_v7 = vsel %vm630_vm0, %v1392_v23, %v1401_v47  ;;  %v1411_v36 = vsel %vm630_vm0, %v1401_v47, %v1410_v10  ;;  %v1665_v23 = vshrl.u32 %v2331_v30, 16  ;;  %v1560_v47 = vld [vmem:[#allocation2 + $0x48] sm:$0x1] }
 0x17f   : > { %1518 = vmatmul.bf16.gmra.mxu0 %v1402_v7  ;;  %1332 = vmatmul.bf16.gmra.mxu3 %v3093_v6  ;;  %v1143_v58 = vmul.f32 %v3162_v8, %v1079_v53  ;;  %v1663_v6 = vrot.slane %v1661_v61, 1  ;;  %v1679_v7 = vrot.slane %v1677_v48, 1  ;;  %v2447_v53 = vunpack.c.h.b16 %v2510_v39 }
 0x180   : > { %v1611_v30 = vunpack.c.l.b16 %v1560_v47 }
 0x181   : > { %v1145_v2 = vadd.f32 %v3168_v50, %v1143_v58  ;;  %v1664_v15 = vsel %vm893_vm1, %v1659_v4, %v1663_v6  ;;  %v1667_v28 = vor.u32 %v1665_v23, %v1663_v6  ;;  %v1358_v56 = vpack.c.b16 %v2447_v53, %v2447_v53 }
 0x183   : > { %v1147_v11 = vmax.f32 %v1145_v2, 0.0  ;;  %v1431_v58 = vshrl.u32 %v1358_v56, 16 }
 0x184   : > { %v1059_v60 = vpop.f32.mrf.mxu2 }
 0x185   : > { %v1080_v62 = vadd.f32 %v1059_v60, %v809_v57  ;;  %v1620_v57 = vpack.c.b16 %v1611_v30, %v1611_v30  ;;  %v1434_v60 = vshll.u32 %v1358_v56, 16  ;;  %v1433_v0 = vrot.slane %v1431_v58, 3 }
 0x187   : > { %v1144_v3 = vmul.f32 %v3162_v8, %v1080_v62  ;;  %v958_v8 = vshll.u32 %v892_v14, 16  ;;  %v1681_v62 = vshrl.u32 %v2333_v40, 16  ;;  %v1685_v13 = vshll.u32 %v1620_v57, 16 }
 0x188   : > { %v1436_v1 = vrot.slane %v1434_v60, 4  ;;  %v2263_v60 = vld [vmem:[%s3047_s20 + $0x28] sm:$0xff] }
 0x189   : > { %v1146_v5 = vadd.f32 %v3168_v50, %v1144_v3  ;;  %v956_v50 = vor.u32 %v954_v20, %v3139_v59  ;;  %v960_v21 = vrot.slane %v958_v8, 1  ;;  %v1683_v2 = vor.u32 %v1681_v62, %v1679_v7  ;;  %v1829_v20 = vld [vmem:[%s3047_s20 + $0x8] sm:$0xff] }
 0x18a   : > { %v1687_v3 = vrot.slane %v1685_v13, 1  ;;  %v1437_v6 = vor.u32 %v1436_v1, %v1433_v0 }
 0x18b   : > { %v1148_v12 = vmax.f32 %v1146_v5, 0.0  ;;  %v961_v33 = vsel %vm893_vm1, %v956_v50, %v960_v21 }
 0x18c   : > { %1773 = vmatmul.bf16.gmra.mxu1 %v1664_v15  ;;  %1061 = vmatmul.bf16.gmra.mxu2 %v961_v33  ;;  %v1688_v4 = vsel %vm893_vm1, %v1683_v2, %v1687_v3 }
 0x18d   : > { %v2414_v17 = vpack.c.bf16 %v1148_v12, %v1147_v11  ;;  %v1828_v11 = vld [vmem:[%s3047_s20] sm:$0xff] }
 0x18f   : > { %2502 = vst [vmem:[#allocation2 + $0x38] sm:$0xff] %v2414_v17   ;;  %1523 = vmatmul.bf16.gmra.mxu0 %v1411_v36  ;;  %1337 = vmatmul.bf16.gmra.mxu3 %v2414_v17 }
 0x196   : > { %v2332_v26 = vld [vmem:[#allocation2 + $0x38] sm:$0xff] }
 0x197   : > { %v2578_v27 = vld [vmem:[#allocation2 + $0x34] sm:$0xff]   ;;  %v1669_v44 = vshll.u32 %v2332_v26, 16  ;;  %v2579_v38 = vld [vmem:[#allocation2 + $0x3c] sm:$0xff]   ;;  %v1673_v63 = vshrl.u32 %v2332_v26, 16 }
 0x198   : > { %v1413_v46 = vshrl.u32 %v2578_v27, 16  ;;  %v1416_v29 = vshll.u32 %v2578_v27, 16  ;;  %v1422_v41 = vshrl.u32 %v2579_v38, 16  ;;  %v1425_v42 = vshll.u32 %v2579_v38, 16  ;;  %v2259_v38 = vld [vmem:[%s3047_s20 + $0x18] sm:$0xff] }
 0x199   : > { %v1671_v37 = vrot.slane %v1669_v44, 1 }
 0x19a   : > { %v1415_v31 = vrot.slane %v1413_v46, 3  ;;  %v1418_v32 = vrot.slane %v1416_v29, 4  ;;  %v1424_v43 = vrot.slane %v1422_v41, 3  ;;  %v1427_v45 = vrot.slane %v1425_v42, 4 }
 0x19b   : > { %v1672_v34 = vsel %vm893_vm1, %v1667_v28, %v1671_v37  ;;  %v1675_v49 = vor.u32 %v1673_v63, %v1671_v37 }
 0x19c   : > { %v1419_v35 = vor.u32 %v1418_v32, %v1415_v31  ;;  %1778 = vmatmul.bf16.gmra.mxu1 %v1672_v34  ;;  %v1428_v52 = vor.u32 %v1427_v45, %v1424_v43 }
 0x19d   : > { %v1680_v54 = vsel %vm893_vm1, %v1675_v49, %v1679_v7 }
 0x19e   : > { %v1420_v59 = vsel %vm630_vm0, %v1410_v10, %v1419_v35  ;;  %v1429_v55 = vsel %vm630_vm0, %v1419_v35, %v1428_v52  ;;  %v1438_v22 = vsel %vm630_vm0, %v1428_v52, %v1437_v6  ;;  %v2262_v52 = vld [vmem:[%s3047_s20 + $0x20] sm:$0xff] }
 0x19f   : > { %1528 = vmatmul.bf16.gmra.mxu0 %v1420_v59  ;;  %1342 = vmatmul.bf16.gmra.mxu3 %v2510_v39 }
 0x1ac   : > { %1783 = vmatmul.bf16.gmra.mxu1 %v1680_v54 }
 0x1af   : > { %1533 = vmatmul.bf16.gmra.mxu0 %v1429_v55 }
 0x1b2   : > { %v1308_v61 = vpop.f32.mrf.mxu3 }
 0x1ba   : > { %v1310_v51 = vpop.f32.mrf.mxu3 }
 0x1bc   : > { %v1754_v9 = vpop.f32.mrf.mxu1  ;;  %1788 = vmatmul.bf16.gmra.mxu1 %v1688_v4 }
 0x1bd   : > { %v1504_v5 = vpop.f32.mrf.mxu0 }
 0x1be   : > { %v1505_v10 = vadd.f32 %v1504_v5, %v1308_v61 }
 0x1bf   : > { %1538 = vmatmul.bf16.gmra.mxu0 %v1438_v22  ;;  %v2266_v22 = vld [vmem:[%s3047_s20 + $0x30] sm:$0xff] }
 0x1c0   : > { %v1794_v12 = vadd.f32 %v1754_v9, %v1505_v10 }
 0x1c2   : > { %v1830_v14 = vadd.f32 %v1828_v11, %v1794_v12  ;;  %v1313_v15 = vpop.f32.mrf.mxu3 }
 0x1c4   : > { %1832 = vst [vmem:[%s3214_s21] sm:$0xff] %v1830_v14  ;;  %v1756_v18 = vpop.f32.mrf.mxu1 }
 0x1c5   : > { %v1506_v16 = vpop.f32.mrf.mxu0 }
 0x1c6   : > { %v1507_v17 = vadd.f32 %v1506_v16, %v1310_v51 }
 0x1c8   : > { %v1795_v8 = vadd.f32 %v1756_v18, %v1507_v17  ;;  %v2267_v17 = vld [vmem:[%s3047_s20 + $0x38] sm:$0xff] }
 0x1ca   : > { %v1831_v36 = vadd.f32 %v1829_v20, %v1795_v8  ;;  %v1315_v50 = vpop.f32.mrf.mxu3 }
 0x1cc   : > { %1833 = vst [vmem:[%s3214_s21 + $0x8] sm:$0xff] %v1831_v36 }
 0x1d2   : > { %v1318_v21 = vpop.f32.mrf.mxu3 }
 0x1d9   : > { %v1759_v33 = vpop.f32.mrf.mxu1 }
 0x1da   : > { %v1320_v23 = vpop.f32.mrf.mxu3 }
 0x1dc   : > { %v1509_v24 = vpop.f32.mrf.mxu0 }
 0x1e1   : > { %v1761_v25 = vpop.f32.mrf.mxu1 }
 0x1e2   : > { %v1323_v26 = vpop.f32.mrf.mxu3 }
 0x1e4   : > { %v1511_v27 = vpop.f32.mrf.mxu0 }
 0x1e9   : > { %v1764_v28 = vpop.f32.mrf.mxu1 }
 0x1ea   : > { %v1325_v44 = vpop.f32.mrf.mxu3 }
 0x1ec   : > { %v1514_v46 = vpop.f32.mrf.mxu0 }
 0x1ed   : > { %v1515_v29 = vadd.f32 %v1514_v46, %v1318_v21 }
 0x1ef   : > { %v1798_v37 = vadd.f32 %v1764_v28, %v1515_v29 }
 0x1f1   : > { %v1838_v31 = vadd.f32 %v3098_v19, %v1798_v37  ;;  %v1766_v32 = vpop.f32.mrf.mxu1 }
 0x1f2   : > { %v1328_v34 = vpop.f32.mrf.mxu3 }
 0x1f3   : > { %2260 = vst [vmem:[%s3214_s21 + $0x10] sm:$0xff] %v1838_v31 }
 0x1f4   : > { %v1516_v35 = vpop.f32.mrf.mxu0 }
 0x1f5   : > { %v1517_v59 = vadd.f32 %v1516_v35, %v1320_v23 }
 0x1f7   : > { %v1799_v39 = vadd.f32 %v1766_v32, %v1517_v59 }
 0x1f9   : > { %v1839_v40 = vadd.f32 %v2259_v38, %v1799_v39  ;;  %v1769_v41 = vpop.f32.mrf.mxu1 }
 0x1fa   : > { %v1330_v42 = vpop.f32.mrf.mxu3 }
 0x1fb   : > { %2261 = vst [vmem:[%s3214_s21 + $0x18] sm:$0xff] %v1839_v40 }
 0x1fc   : > { %v1519_v48 = vpop.f32.mrf.mxu0 }
 0x201   : > { %v1771_v63 = vpop.f32.mrf.mxu1 }
 0x202   : > { %v1333_v43 = vpop.f32.mrf.mxu3 }
 0x204   : > { %v1521_v45 = vpop.f32.mrf.mxu0 }
 0x209   : > { %v1774_v47 = vpop.f32.mrf.mxu1 }
 0x20a   : > { %v1335_v19 = vpop.f32.mrf.mxu3 }
 0x20c   : > { %v1524_v49 = vpop.f32.mrf.mxu0 }
 0x20d   : > { %v1525_v7 = vadd.f32 %v1524_v49, %v1328_v34 }
 0x20f   : > { %v1802_v53 = vadd.f32 %v1774_v47, %v1525_v7  ;;  %v1062_v58 = vpop.f32.mrf.mxu2 }
 0x211   : > { %v1847_v30 = vadd.f32 %v2262_v52, %v1802_v53  ;;  %v1776_v54 = vpop.f32.mrf.mxu1 }
 0x212   : > { %v1338_v55 = vpop.f32.mrf.mxu3 }
 0x213   : > { %2264 = vst [vmem:[%s3214_s21 + $0x20] sm:$0xff] %v1847_v30 }
 0x214   : > { %v1526_v56 = vpop.f32.mrf.mxu0 }
 0x215   : > { %v1527_v57 = vadd.f32 %v1526_v56, %v1330_v42 }
 0x217   : > { %v1803_v61 = vadd.f32 %v1776_v54, %v1527_v57  ;;  %v1064_v2 = vpop.f32.mrf.mxu2 }
 0x219   : > { %v1848_v62 = vadd.f32 %v2263_v60, %v1803_v61  ;;  %v1779_v13 = vpop.f32.mrf.mxu1 }
 0x21a   : > { %v1340_v0 = vpop.f32.mrf.mxu3 }
 0x21b   : > { %2265 = vst [vmem:[%s3214_s21 + $0x28] sm:$0xff] %v1848_v62 }
 0x21c   : > { %v1529_v1 = vpop.f32.mrf.mxu0 }
 0x221   : > { %v1781_v3 = vpop.f32.mrf.mxu1 }
 0x222   : > { %v1343_v4 = vpop.f32.mrf.mxu3 }
 0x224   : > { %v1531_v6 = vpop.f32.mrf.mxu0 }
 0x229   : > { %v1784_v51 = vpop.f32.mrf.mxu1 }
 0x22a   : > { %v1345_v5 = vpop.f32.mrf.mxu3 }
 0x22c   : > { %v1534_v9 = vpop.f32.mrf.mxu0 }
 0x22d   : > { %v1535_v10 = vadd.f32 %v1534_v9, %v1338_v55 }
 0x22f   : > { %v1806_v11 = vadd.f32 %v1784_v51, %v1535_v10 }
 0x231   : > { %v1856_v12 = vadd.f32 %v2266_v22, %v1806_v11  ;;  %v1786_v14 = vpop.f32.mrf.mxu1 }
 0x233   : > { %2268 = vst [vmem:[%s3214_s21 + $0x30] sm:$0xff] %v1856_v12 }
 0x234   : > { %v1536_v15 = vpop.f32.mrf.mxu0 }
 0x235   : > { %v1537_v16 = vadd.f32 %v1536_v15, %v1340_v0 }
 0x237   : > { %v1807_v18 = vadd.f32 %v1786_v14, %v1537_v16 }
 0x239   : > { %v1857_v20 = vadd.f32 %v2267_v17, %v1807_v18  ;;  %v1789_v8 = vpop.f32.mrf.mxu1 }
 0x23b   : > { %2269 = vst [vmem:[%s3214_s21 + $0x38] sm:$0xff] %v1857_v20 }
 0x23c   : > { %v1539_v36 = vpop.f32.mrf.mxu0 }
 0x23d   : > { %2831 = shalt.err (!%p2828_p11)
}
 0x23e   : > { %s2888_s19 = smov 128   ;;  %s2889_s21 = smov 8  }
 0x23f   : > { %2610 = dma.vmem_to_hbm [thread:$0]  (%p3013_p7), %s1876_s15, 1024, %s1878_s1, %s1862_s28, %s2888_s19, %s2888_s19, %s2889_s21  }
 0x241   : > { %v1791_v50 = vpop.f32.mrf.mxu1 }
 0x244   : > { %v1541_v21 = vpop.f32.mrf.mxu0 }
 0x245 PF: > { %s1892_s22 = sand.u32 1, %s2866_s24   ;;  %p3281_p12 = scmp.ge.s32.totalorder %s2878_s27, 2 }
 0x246   : > { %s1893_s23 = scalar_lea.sflag [#allocation6], %s1892_s22 }
 0x247   : > { %p2627_p13 = pnand %p3281_p12, %p2965_p6 }
 0x249   : > { %p2628_p0 = pneg %p2627_p13 }
 0x24b   : > { %2861 = dma.done.wait (%p2628_p0), %s1893_s23, 1024  }
 0x24c   : > { %2863 = vsyncadd (%p2628_p0), %s1893_s23, 4294966272  ;;  %p22_p7 = scmp.ge.s32.totalorder %s2999_s11, 4   ;;  %s3282_s24 = smov %s2870_s25 }
 0x24d   : > { %s3283_s25 = smov %s2874_s26  ;;  %s3284_s26 = smov %s3009_s16 }
 0x24e   : > { %s3285_s27 = smov %s2999_s11  ;;  %24 = sbr.rel (!%p22_p7) target bundleno = 9 (0x9), region = 115 }
 0x253   :  { %1899 = vsyncpa [#allocation5], 1 }
 0x254   :  { %1901 = vsyncpa [#allocation5 + $0x1], 1 }
 0x255   :  { %1902 = vsyncpa [#allocation8], 1 }
 0x256   :  { %1903 = vsyncpa [#allocation11], 1 }
 0x257   :  { %1904 = vsyncpa [#allocation6], 1 }
 0x258   :  { %1906 = vsyncpa [#allocation6 + $0x1], 1 }

</bundles_post_ra>
